<compile_context>
chip_gen: v7x
topology: tpu7x:2x2x1
jax: 0.10.0
libtpu: 0.0.40
codegen_flags: <defaults>
</compile_context>

<pallas_src>
import jax
import jax.numpy as jnp
from jax.experimental import pallas as pl
from jax.experimental.pallas import tpu as pltpu


_COL0 = 8  # sublane-aligned column at which the mid activation is stored in the scratch


def _round_up(x, m):
    return (x + m - 1) // m * m


def _double_conv_kernel(p1_ref, w1_ref, s1_ref, b1_ref, w2_ref, s2_ref, b2_ref,
                        o_ref, xp2_ref):
    # p1_ref : (1, H*W, 9*Cin) bf16   im2col patches of one input image
    # w1_ref : (9*Cin, Cmid)   bf16
    # w2_ref : (9, Cmid, Cout) bf16   per-tap weights of the second conv
    # s*/b*  : (1, C)          f32    folded BatchNorm scale / shift (inference)
    # o_ref  : (1, H, W, Cout) f32
    # xp2_ref: (H+2, Wp, Cmid) f32    VMEM scratch: zero-padded mid activation
    H = o_ref.shape[1]
    W = o_ref.shape[2]
    Cout = o_ref.shape[3]
    Cmid = w1_ref.shape[1]
    HW = H * W

    # ---- conv1 + BN + ReLU: one MXU matmul, contraction K = 9*Cin ----
    y1 = jnp.dot(p1_ref[0], w1_ref[...], preferred_element_type=jnp.float32)
    y1 = jnp.maximum(y1 * s1_ref[...] + b1_ref[...], 0.0)            # (HW, Cmid) f32

    # ---- zero-pad mid activation inside VMEM (halo rows 0 / H+1, cols COL0-1 / COL0+W)
    xp2_ref[...] = jnp.zeros_like(xp2_ref)
    xp2_ref[1:H + 1, _COL0:_COL0 + W, :] = y1.reshape(H, W, Cmid)    # aligned, unmasked

    # ---- conv2 + BN + ReLU: 9 shifted-window bf16 matmuls (K = Cmid), f32 accumulate ----
    acc = jnp.zeros((HW, Cout), jnp.float32)
    for dh in range(3):
        for dw in range(3):
            c0 = _COL0 - 1 + dw
            win = xp2_ref[dh:dh + H, c0:c0 + W, :].reshape(HW, Cmid)
            acc = acc + jnp.dot(win.astype(jnp.bfloat16), w2_ref[dh * 3 + dw],
                                preferred_element_type=jnp.float32)
    y2 = jnp.maximum(acc * s2_ref[...] + b2_ref[...], 0.0)
    o_ref[0] = y2.reshape(H, W, Cout)


def double_conv_nhwc(x, params):
    """Fused DoubleConv on an NHWC float32 input. Returns NHWC float32."""
    N, H, W, Cin = x.shape
    Cmid = params["w1"].shape[-1]
    Cout = params["w2"].shape[-1]
    HW = H * W
    Wp = _round_up(_COL0 + W + 1, 8)           # width of the padded-mid VMEM scratch

    # im2col for the first (shallow-K) conv: (N, H*W, 9*Cin), tap-major / channel-minor,
    # matching w1.reshape(9*Cin, Cmid) below.
    xp = jnp.pad(x, ((0, 0), (1, 1), (1, 1), (0, 0)))
    p1 = jnp.concatenate(
        [xp[:, dh:dh + H, dw:dw + W, :] for dh in range(3) for dw in range(3)],
        axis=-1).reshape(N, HW, 9 * Cin).astype(jnp.bfloat16)

    w1 = params["w1"].reshape(9 * Cin, Cmid).astype(jnp.bfloat16)    # HWIO -> (9*Cin, Cmid)
    w2 = params["w2"].reshape(9, Cmid, Cout).astype(jnp.bfloat16)    # HWIO -> (9, Cmid, Cout)
    s1 = params["s1"].reshape(1, Cmid).astype(jnp.float32)
    b1 = params["b1"].reshape(1, Cmid).astype(jnp.float32)
    s2 = params["s2"].reshape(1, Cout).astype(jnp.float32)
    b2 = params["b2"].reshape(1, Cout).astype(jnp.float32)

    return pl.pallas_call(
        _double_conv_kernel,
        out_shape=jax.ShapeDtypeStruct((N, H, W, Cout), jnp.float32),
        grid=(N,),
        in_specs=[
            pl.BlockSpec((1, HW, 9 * Cin), lambda n: (n, 0, 0)),
            pl.BlockSpec((9 * Cin, Cmid), lambda n: (0, 0)),
            pl.BlockSpec((1, Cmid), lambda n: (0, 0)),
            pl.BlockSpec((1, Cmid), lambda n: (0, 0)),
            pl.BlockSpec((9, Cmid, Cout), lambda n: (0, 0, 0)),
            pl.BlockSpec((1, Cout), lambda n: (0, 0)),
            pl.BlockSpec((1, Cout), lambda n: (0, 0)),
        ],
        out_specs=pl.BlockSpec((1, H, W, Cout), lambda n: (n, 0, 0, 0)),
        scratch_shapes=[pltpu.VMEM((H + 2, Wp, Cmid), jnp.float32)],
        compiler_params=pltpu.CompilerParams(
            dimension_semantics=("parallel",),          # megacore batch sharding on v7x
            vmem_limit_bytes=48 * 1024 * 1024),
    )(p1, w1, s1, b1, w2, s2, b2)


# ----------------------------------------------------------------------------
# Parameters (synthetic, deterministic), BN folded to inference scale/shift
# ----------------------------------------------------------------------------

def _init_conv_hwio(key, kh, kw, cin, cout):
    fan_in = float(kh * kw * cin)
    return jax.random.normal(key, (kh, kw, cin, cout), jnp.float32) / (fan_in ** 0.5)


def _init_bn_folded(key, c):
    k1, k2, k3, k4 = jax.random.split(key, 4)
    gamma = 1.0 + 0.1 * jax.random.normal(k1, (c,), jnp.float32)
    beta = 0.1 * jax.random.normal(k2, (c,), jnp.float32)
    mean = 0.1 * jax.random.normal(k3, (c,), jnp.float32)
    var = jnp.abs(1.0 + 0.1 * jax.random.normal(k4, (c,), jnp.float32))
    scale = gamma / jnp.sqrt(var + 1e-5)
    shift = beta - mean * scale
    return scale, shift


def init_double_conv_params(key, in_channels, out_channels, mid_channels=None):
    if mid_channels is None:
        mid_channels = out_channels
    k = jax.random.split(key, 4)
    w1 = _init_conv_hwio(k[0], 3, 3, in_channels, mid_channels)
    s1, b1 = _init_bn_folded(k[1], mid_channels)
    w2 = _init_conv_hwio(k[2], 3, 3, mid_channels, out_channels)
    s2, b2 = _init_bn_folded(k[3], out_channels)
    return dict(w1=w1, s1=s1, b1=b1, w2=w2, s2=s2, b2=b2)


# ----------------------------------------------------------------------------
# Module forward (NCHW in / NCHW out, like the PyTorch module) + f32 reference
# ----------------------------------------------------------------------------

def double_conv_forward(x_nchw, params):
    x = jnp.transpose(x_nchw, (0, 2, 3, 1)).astype(jnp.float32)   # NCHW -> NHWC
    y = double_conv_nhwc(x, params)
    return jnp.transpose(y, (0, 3, 1, 2))                         # NHWC -> NCHW


def _double_conv_reference(x_nchw, params):
    """Pure-JAX (XLA) float32 reference used only for validation."""
    x = jnp.transpose(x_nchw, (0, 2, 3, 1)).astype(jnp.float32)

    def conv_bn_relu(h, w, s, b):
        y = jax.lax.conv_general_dilated(
            h, w, window_strides=(1, 1), padding="SAME",
            dimension_numbers=("NHWC", "HWIO", "NHWC"))
        return jnp.maximum(y * s + b, 0.0)

    y = conv_bn_relu(x, params["w1"], params["s1"], params["b1"])
    y = conv_bn_relu(y, params["w2"], params["s2"], params["b2"])
    return jnp.transpose(y, (0, 3, 1, 2))


# ----------------------------------------------------------------------------
# Main
# ----------------------------------------------------------------------------

if __name__ == "__main__":
    key = jax.random.PRNGKey(0)
    k_x, k_p = jax.random.split(key)

    N, C_IN, H, W = 2, 4, 16, 16
    C_OUT = 32

    x = jax.random.normal(k_x, (N, C_IN, H, W), jnp.float32)      # NCHW, like PyTorch
    params = init_double_conv_params(k_p, C_IN, C_OUT)

    fwd = jax.jit(double_conv_forward)
    out = fwd(x, params)
    jax.block_until_ready(out)

    assert out.shape == (N, C_OUT, H, W), out.shape
    assert bool(jnp.all(jnp.isfinite(out)))

    # Correctness check vs. a pure-JAX f32 reference (loose tol: bf16 MXU operands).
    ref = _double_conv_reference(x, params)
    err = float(jnp.max(jnp.abs(out - ref)))
    assert err < 0.3, f"max |pallas - reference| = {err}"

    print("KERNEL_OK")
</pallas_src>

<mosaic_0001>
module attributes {stable_mosaic.version = 11 : i64} {
  func.func @_double_conv_kernel(%arg0: i32, %arg1: memref<1x256x36xbf16, #tpu.memory_space<vmem>>, %arg2: memref<36x32xbf16, #tpu.memory_space<vmem>>, %arg3: memref<1x32xf32, #tpu.memory_space<vmem>>, %arg4: memref<1x32xf32, #tpu.memory_space<vmem>>, %arg5: memref<9x32x32xbf16, #tpu.memory_space<vmem>>, %arg6: memref<1x32xf32, #tpu.memory_space<vmem>>, %arg7: memref<1x32xf32, #tpu.memory_space<vmem>>, %arg8: memref<1x16x16x32xf32, #tpu.memory_space<vmem>>, %arg9: memref<18x32x32xf32, #tpu.memory_space<vmem>>) attributes {dimension_semantics = [#tpu.dimension_semantics<parallel>], iteration_bounds = array<i64: 2>, scalar_prefetch = 0 : i64, scratch_operands = 1 : i64, tpu.core_type = #tpu.core_type<tc>, window_params = [{transform_indices = @transform_0, window_bounds = array<i64: 1, 256, 36>}, {pipeline_mode = #tpu.pipeline_mode<synchronous>, transform_indices = @transform_1, window_bounds = array<i64: 36, 32>}, {pipeline_mode = #tpu.pipeline_mode<synchronous>, transform_indices = @transform_2, window_bounds = array<i64: 1, 32>}, {pipeline_mode = #tpu.pipeline_mode<synchronous>, transform_indices = @transform_3, window_bounds = array<i64: 1, 32>}, {pipeline_mode = #tpu.pipeline_mode<synchronous>, transform_indices = @transform_4, window_bounds = array<i64: 9, 32, 32>}, {pipeline_mode = #tpu.pipeline_mode<synchronous>, transform_indices = @transform_5, window_bounds = array<i64: 1, 32>}, {pipeline_mode = #tpu.pipeline_mode<synchronous>, transform_indices = @transform_6, window_bounds = array<i64: 1, 32>}, {transform_indices = @transform_7, window_bounds = array<i64: 1, 16, 16, 32>}]} {
    %c0 = arith.constant 0 : index
    %c0_0 = arith.constant 0 : index
    %c0_1 = arith.constant 0 : index
    %0 = vector.load %arg1[%c0, %c0_0, %c0_1] : memref<1x256x36xbf16, #tpu.memory_space<vmem>>, vector<1x256x36xbf16>
    %1 = vector.shape_cast %0 : vector<1x256x36xbf16> to vector<256x36xbf16>
    %c0_2 = arith.constant 0 : index
    %c0_3 = arith.constant 0 : index
    %2 = vector.load %arg2[%c0_2, %c0_3] : memref<36x32xbf16, #tpu.memory_space<vmem>>, vector<36x32xbf16>
    %cst = arith.constant dense<0.000000e+00> : vector<256x32xf32>
    %3 = tpu.matmul %1, %2, %cst {dimension_numbers = #tpu.dot_dimension_numbers<[1], [0], [0], [1], [0, 0, 1, 1], [], []>} : vector<256x36xbf16>, vector<36x32xbf16>, vector<256x32xf32> -> vector<256x32xf32>
    %c0_4 = arith.constant 0 : index
    %c0_5 = arith.constant 0 : index
    %4 = vector.load %arg3[%c0_4, %c0_5] : memref<1x32xf32, #tpu.memory_space<vmem>>, vector<1x32xf32>
    %5 = vector.broadcast %4 : vector<1x32xf32> to vector<256x32xf32>
    %6 = arith.mulf %3, %5 : vector<256x32xf32>
    %c0_6 = arith.constant 0 : index
    %c0_7 = arith.constant 0 : index
    %7 = vector.load %arg4[%c0_6, %c0_7] : memref<1x32xf32, #tpu.memory_space<vmem>>, vector<1x32xf32>
    %8 = vector.broadcast %7 : vector<1x32xf32> to vector<256x32xf32>
    %9 = arith.addf %6, %8 : vector<256x32xf32>
    %cst_8 = arith.constant 0.000000e+00 : f32
    %10 = vector.broadcast %cst_8 : f32 to vector<256x32xf32>
    %11 = arith.maximumf %9, %10 : vector<256x32xf32>
    %cst_9 = arith.constant 0.000000e+00 : f32
    %12 = vector.broadcast %cst_9 : f32 to vector<18x32x32xf32>
    %c0_10 = arith.constant 0 : index
    %c0_11 = arith.constant 0 : index
    %c0_12 = arith.constant 0 : index
    %13 = vector.load %arg9[%c0_10, %c0_11, %c0_12] : memref<18x32x32xf32, #tpu.memory_space<vmem>>, vector<18x32x32xf32>
    tpu.vector_store %arg9[%c0_10, %c0_11, %c0_12], %12 {strides = array<i32>} : memref<18x32x32xf32, #tpu.memory_space<vmem>>, vector<18x32x32xf32>,
    %14 = vector.shape_cast %11 : vector<256x32xf32> to vector<16x16x32xf32>
    %c1 = arith.constant 1 : index
    %c8 = arith.constant 8 : index
    %c0_13 = arith.constant 0 : index
    %15 = vector.load %arg9[%c1, %c8, %c0_13] : memref<18x32x32xf32, #tpu.memory_space<vmem>>, vector<16x16x32xf32>
    tpu.vector_store %arg9[%c1, %c8, %c0_13], %14 {strides = array<i32>} : memref<18x32x32xf32, #tpu.memory_space<vmem>>, vector<16x16x32xf32>,
    %cst_14 = arith.constant 0.000000e+00 : f32
    %16 = vector.broadcast %cst_14 : f32 to vector<256x32xf32>
    %c0_15 = arith.constant 0 : index
    %c7 = arith.constant 7 : index
    %c0_16 = arith.constant 0 : index
    %17 = vector.load %arg9[%c0_15, %c7, %c0_16] : memref<18x32x32xf32, #tpu.memory_space<vmem>>, vector<16x16x32xf32>
    %18 = vector.shape_cast %17 : vector<16x16x32xf32> to vector<256x32xf32>
    %19 = arith.truncf %18 : vector<256x32xf32> to vector<256x32xbf16>
    %c0_17 = arith.constant 0 : index
    %c0_18 = arith.constant 0 : index
    %c0_19 = arith.constant 0 : index
    %20 = vector.load %arg5[%c0_17, %c0_18, %c0_19] : memref<9x32x32xbf16, #tpu.memory_space<vmem>>, vector<1x32x32xbf16>
    %21 = vector.shape_cast %20 : vector<1x32x32xbf16> to vector<32x32xbf16>
    %cst_20 = arith.constant dense<0.000000e+00> : vector<256x32xf32>
    %22 = tpu.matmul %19, %21, %cst_20 {dimension_numbers = #tpu.dot_dimension_numbers<[1], [0], [0], [1], [0, 0, 1, 1], [], []>} : vector<256x32xbf16>, vector<32x32xbf16>, vector<256x32xf32> -> vector<256x32xf32>
    %23 = arith.addf %16, %22 : vector<256x32xf32>
    %c0_21 = arith.constant 0 : index
    %c8_22 = arith.constant 8 : index
    %c0_23 = arith.constant 0 : index
    %24 = vector.load %arg9[%c0_21, %c8_22, %c0_23] : memref<18x32x32xf32, #tpu.memory_space<vmem>>, vector<16x16x32xf32>
    %25 = vector.shape_cast %24 : vector<16x16x32xf32> to vector<256x32xf32>
    %26 = arith.truncf %25 : vector<256x32xf32> to vector<256x32xbf16>
    %c1_24 = arith.constant 1 : index
    %c0_25 = arith.constant 0 : index
    %c0_26 = arith.constant 0 : index
    %27 = vector.load %arg5[%c1_24, %c0_25, %c0_26] : memref<9x32x32xbf16, #tpu.memory_space<vmem>>, vector<1x32x32xbf16>
    %28 = vector.shape_cast %27 : vector<1x32x32xbf16> to vector<32x32xbf16>
    %cst_27 = arith.constant dense<0.000000e+00> : vector<256x32xf32>
    %29 = tpu.matmul %26, %28, %cst_27 {dimension_numbers = #tpu.dot_dimension_numbers<[1], [0], [0], [1], [0, 0, 1, 1], [], []>} : vector<256x32xbf16>, vector<32x32xbf16>, vector<256x32xf32> -> vector<256x32xf32>
    %30 = arith.addf %23, %29 : vector<256x32xf32>
    %c0_28 = arith.constant 0 : index
    %c9 = arith.constant 9 : index
    %c0_29 = arith.constant 0 : index
    %31 = vector.load %arg9[%c0_28, %c9, %c0_29] : memref<18x32x32xf32, #tpu.memory_space<vmem>>, vector<16x16x32xf32>
    %32 = vector.shape_cast %31 : vector<16x16x32xf32> to vector<256x32xf32>
    %33 = arith.truncf %32 : vector<256x32xf32> to vector<256x32xbf16>
    %c2 = arith.constant 2 : index
    %c0_30 = arith.constant 0 : index
    %c0_31 = arith.constant 0 : index
    %34 = vector.load %arg5[%c2, %c0_30, %c0_31] : memref<9x32x32xbf16, #tpu.memory_space<vmem>>, vector<1x32x32xbf16>
    %35 = vector.shape_cast %34 : vector<1x32x32xbf16> to vector<32x32xbf16>
    %cst_32 = arith.constant dense<0.000000e+00> : vector<256x32xf32>
    %36 = tpu.matmul %33, %35, %cst_32 {dimension_numbers = #tpu.dot_dimension_numbers<[1], [0], [0], [1], [0, 0, 1, 1], [], []>} : vector<256x32xbf16>, vector<32x32xbf16>, vector<256x32xf32> -> vector<256x32xf32>
    %37 = arith.addf %30, %36 : vector<256x32xf32>
    %c1_33 = arith.constant 1 : index
    %c7_34 = arith.constant 7 : index
    %c0_35 = arith.constant 0 : index
    %38 = vector.load %arg9[%c1_33, %c7_34, %c0_35] : memref<18x32x32xf32, #tpu.memory_space<vmem>>, vector<16x16x32xf32>
    %39 = vector.shape_cast %38 : vector<16x16x32xf32> to vector<256x32xf32>
    %40 = arith.truncf %39 : vector<256x32xf32> to vector<256x32xbf16>
    %c3 = arith.constant 3 : index
    %c0_36 = arith.constant 0 : index
    %c0_37 = arith.constant 0 : index
    %41 = vector.load %arg5[%c3, %c0_36, %c0_37] : memref<9x32x32xbf16, #tpu.memory_space<vmem>>, vector<1x32x32xbf16>
    %42 = vector.shape_cast %41 : vector<1x32x32xbf16> to vector<32x32xbf16>
    %cst_38 = arith.constant dense<0.000000e+00> : vector<256x32xf32>
    %43 = tpu.matmul %40, %42, %cst_38 {dimension_numbers = #tpu.dot_dimension_numbers<[1], [0], [0], [1], [0, 0, 1, 1], [], []>} : vector<256x32xbf16>, vector<32x32xbf16>, vector<256x32xf32> -> vector<256x32xf32>
    %44 = arith.addf %37, %43 : vector<256x32xf32>
    %c1_39 = arith.constant 1 : index
    %c8_40 = arith.constant 8 : index
    %c0_41 = arith.constant 0 : index
    %45 = vector.load %arg9[%c1_39, %c8_40, %c0_41] : memref<18x32x32xf32, #tpu.memory_space<vmem>>, vector<16x16x32xf32>
    %46 = vector.shape_cast %45 : vector<16x16x32xf32> to vector<256x32xf32>
    %47 = arith.truncf %46 : vector<256x32xf32> to vector<256x32xbf16>
    %c4 = arith.constant 4 : index
    %c0_42 = arith.constant 0 : index
    %c0_43 = arith.constant 0 : index
    %48 = vector.load %arg5[%c4, %c0_42, %c0_43] : memref<9x32x32xbf16, #tpu.memory_space<vmem>>, vector<1x32x32xbf16>
    %49 = vector.shape_cast %48 : vector<1x32x32xbf16> to vector<32x32xbf16>
    %cst_44 = arith.constant dense<0.000000e+00> : vector<256x32xf32>
    %50 = tpu.matmul %47, %49, %cst_44 {dimension_numbers = #tpu.dot_dimension_numbers<[1], [0], [0], [1], [0, 0, 1, 1], [], []>} : vector<256x32xbf16>, vector<32x32xbf16>, vector<256x32xf32> -> vector<256x32xf32>
    %51 = arith.addf %44, %50 : vector<256x32xf32>
    %c1_45 = arith.constant 1 : index
    %c9_46 = arith.constant 9 : index
    %c0_47 = arith.constant 0 : index
    %52 = vector.load %arg9[%c1_45, %c9_46, %c0_47] : memref<18x32x32xf32, #tpu.memory_space<vmem>>, vector<16x16x32xf32>
    %53 = vector.shape_cast %52 : vector<16x16x32xf32> to vector<256x32xf32>
    %54 = arith.truncf %53 : vector<256x32xf32> to vector<256x32xbf16>
    %c5 = arith.constant 5 : index
    %c0_48 = arith.constant 0 : index
    %c0_49 = arith.constant 0 : index
    %55 = vector.load %arg5[%c5, %c0_48, %c0_49] : memref<9x32x32xbf16, #tpu.memory_space<vmem>>, vector<1x32x32xbf16>
    %56 = vector.shape_cast %55 : vector<1x32x32xbf16> to vector<32x32xbf16>
    %cst_50 = arith.constant dense<0.000000e+00> : vector<256x32xf32>
    %57 = tpu.matmul %54, %56, %cst_50 {dimension_numbers = #tpu.dot_dimension_numbers<[1], [0], [0], [1], [0, 0, 1, 1], [], []>} : vector<256x32xbf16>, vector<32x32xbf16>, vector<256x32xf32> -> vector<256x32xf32>
    %58 = arith.addf %51, %57 : vector<256x32xf32>
    %c2_51 = arith.constant 2 : index
    %c7_52 = arith.constant 7 : index
    %c0_53 = arith.constant 0 : index
    %59 = vector.load %arg9[%c2_51, %c7_52, %c0_53] : memref<18x32x32xf32, #tpu.memory_space<vmem>>, vector<16x16x32xf32>
    %60 = vector.shape_cast %59 : vector<16x16x32xf32> to vector<256x32xf32>
    %61 = arith.truncf %60 : vector<256x32xf32> to vector<256x32xbf16>
    %c6 = arith.constant 6 : index
    %c0_54 = arith.constant 0 : index
    %c0_55 = arith.constant 0 : index
    %62 = vector.load %arg5[%c6, %c0_54, %c0_55] : memref<9x32x32xbf16, #tpu.memory_space<vmem>>, vector<1x32x32xbf16>
    %63 = vector.shape_cast %62 : vector<1x32x32xbf16> to vector<32x32xbf16>
    %cst_56 = arith.constant dense<0.000000e+00> : vector<256x32xf32>
    %64 = tpu.matmul %61, %63, %cst_56 {dimension_numbers = #tpu.dot_dimension_numbers<[1], [0], [0], [1], [0, 0, 1, 1], [], []>} : vector<256x32xbf16>, vector<32x32xbf16>, vector<256x32xf32> -> vector<256x32xf32>
    %65 = arith.addf %58, %64 : vector<256x32xf32>
    %c2_57 = arith.constant 2 : index
    %c8_58 = arith.constant 8 : index
    %c0_59 = arith.constant 0 : index
    %66 = vector.load %arg9[%c2_57, %c8_58, %c0_59] : memref<18x32x32xf32, #tpu.memory_space<vmem>>, vector<16x16x32xf32>
    %67 = vector.shape_cast %66 : vector<16x16x32xf32> to vector<256x32xf32>
    %68 = arith.truncf %67 : vector<256x32xf32> to vector<256x32xbf16>
    %c7_60 = arith.constant 7 : index
    %c0_61 = arith.constant 0 : index
    %c0_62 = arith.constant 0 : index
    %69 = vector.load %arg5[%c7_60, %c0_61, %c0_62] : memref<9x32x32xbf16, #tpu.memory_space<vmem>>, vector<1x32x32xbf16>
    %70 = vector.shape_cast %69 : vector<1x32x32xbf16> to vector<32x32xbf16>
    %cst_63 = arith.constant dense<0.000000e+00> : vector<256x32xf32>
    %71 = tpu.matmul %68, %70, %cst_63 {dimension_numbers = #tpu.dot_dimension_numbers<[1], [0], [0], [1], [0, 0, 1, 1], [], []>} : vector<256x32xbf16>, vector<32x32xbf16>, vector<256x32xf32> -> vector<256x32xf32>
    %72 = arith.addf %65, %71 : vector<256x32xf32>
    %c2_64 = arith.constant 2 : index
    %c9_65 = arith.constant 9 : index
    %c0_66 = arith.constant 0 : index
    %73 = vector.load %arg9[%c2_64, %c9_65, %c0_66] : memref<18x32x32xf32, #tpu.memory_space<vmem>>, vector<16x16x32xf32>
    %74 = vector.shape_cast %73 : vector<16x16x32xf32> to vector<256x32xf32>
    %75 = arith.truncf %74 : vector<256x32xf32> to vector<256x32xbf16>
    %c8_67 = arith.constant 8 : index
    %c0_68 = arith.constant 0 : index
    %c0_69 = arith.constant 0 : index
    %76 = vector.load %arg5[%c8_67, %c0_68, %c0_69] : memref<9x32x32xbf16, #tpu.memory_space<vmem>>, vector<1x32x32xbf16>
    %77 = vector.shape_cast %76 : vector<1x32x32xbf16> to vector<32x32xbf16>
    %cst_70 = arith.constant dense<0.000000e+00> : vector<256x32xf32>
    %78 = tpu.matmul %75, %77, %cst_70 {dimension_numbers = #tpu.dot_dimension_numbers<[1], [0], [0], [1], [0, 0, 1, 1], [], []>} : vector<256x32xbf16>, vector<32x32xbf16>, vector<256x32xf32> -> vector<256x32xf32>
    %79 = arith.addf %72, %78 : vector<256x32xf32>
    %c0_71 = arith.constant 0 : index
    %c0_72 = arith.constant 0 : index
    %80 = vector.load %arg6[%c0_71, %c0_72] : memref<1x32xf32, #tpu.memory_space<vmem>>, vector<1x32xf32>
    %81 = vector.broadcast %80 : vector<1x32xf32> to vector<256x32xf32>
    %82 = arith.mulf %79, %81 : vector<256x32xf32>
    %c0_73 = arith.constant 0 : index
    %c0_74 = arith.constant 0 : index
    %83 = vector.load %arg7[%c0_73, %c0_74] : memref<1x32xf32, #tpu.memory_space<vmem>>, vector<1x32xf32>
    %84 = vector.broadcast %83 : vector<1x32xf32> to vector<256x32xf32>
    %85 = arith.addf %82, %84 : vector<256x32xf32>
    %cst_75 = arith.constant 0.000000e+00 : f32
    %86 = vector.broadcast %cst_75 : f32 to vector<256x32xf32>
    %87 = arith.maximumf %85, %86 : vector<256x32xf32>
    %88 = vector.shape_cast %87 : vector<256x32xf32> to vector<16x16x32xf32>
    %c0_76 = arith.constant 0 : index
    %c0_77 = arith.constant 0 : index
    %c0_78 = arith.constant 0 : index
    %c0_79 = arith.constant 0 : index
    %89 = vector.load %arg8[%c0_76, %c0_77, %c0_78, %c0_79] : memref<1x16x16x32xf32, #tpu.memory_space<vmem>>, vector<1x16x16x32xf32>
    %90 = vector.shape_cast %89 : vector<1x16x16x32xf32> to vector<16x16x32xf32>
    %91 = vector.shape_cast %88 : vector<16x16x32xf32> to vector<1x16x16x32xf32>
    tpu.vector_store %arg8[%c0_76, %c0_77, %c0_78, %c0_79], %91 {strides = array<i32>} : memref<1x16x16x32xf32, #tpu.memory_space<vmem>>, vector<1x16x16x32xf32>,
    return
  }
  func.func @transform_0(%arg0: i32) -> (i32, i32, i32) {
    %c0_i32 = arith.constant 0 : i32
    %c0_i32_0 = arith.constant 0 : i32
    %c0_i32_1 = arith.constant 0 : i32
    return %arg0, %c0_i32, %c0_i32_0 : i32, i32, i32
  }
  func.func @transform_1(%arg0: i32) -> (i32, i32) {
    %c0_i32 = arith.constant 0 : i32
    %c0_i32_0 = arith.constant 0 : i32
    %c0_i32_1 = arith.constant 0 : i32
    return %c0_i32, %c0_i32_0 : i32, i32
  }
  func.func @transform_2(%arg0: i32) -> (i32, i32) {
    %c0_i32 = arith.constant 0 : i32
    %c0_i32_0 = arith.constant 0 : i32
    %c0_i32_1 = arith.constant 0 : i32
    return %c0_i32, %c0_i32_0 : i32, i32
  }
  func.func @transform_3(%arg0: i32) -> (i32, i32) {
    %c0_i32 = arith.constant 0 : i32
    %c0_i32_0 = arith.constant 0 : i32
    %c0_i32_1 = arith.constant 0 : i32
    return %c0_i32, %c0_i32_0 : i32, i32
  }
  func.func @transform_4(%arg0: i32) -> (i32, i32, i32) {
    %c0_i32 = arith.constant 0 : i32
    %c0_i32_0 = arith.constant 0 : i32
    %c0_i32_1 = arith.constant 0 : i32
    %c0_i32_2 = arith.constant 0 : i32
    return %c0_i32, %c0_i32_0, %c0_i32_1 : i32, i32, i32
  }
  func.func @transform_5(%arg0: i32) -> (i32, i32) {
    %c0_i32 = arith.constant 0 : i32
    %c0_i32_0 = arith.constant 0 : i32
    %c0_i32_1 = arith.constant 0 : i32
    return %c0_i32, %c0_i32_0 : i32, i32
  }
  func.func @transform_6(%arg0: i32) -> (i32, i32) {
    %c0_i32 = arith.constant 0 : i32
    %c0_i32_0 = arith.constant 0 : i32
    %c0_i32_1 = arith.constant 0 : i32
    return %c0_i32, %c0_i32_0 : i32, i32
  }
  func.func @transform_7(%arg0: i32) -> (i32, i32, i32, i32) {
    %c0_i32 = arith.constant 0 : i32
    %c0_i32_0 = arith.constant 0 : i32
    %c0_i32_1 = arith.constant 0 : i32
    %c0_i32_2 = arith.constant 0 : i32
    return %arg0, %c0_i32, %c0_i32_0, %c0_i32_1 : i32, i32, i32, i32
  }
}

</mosaic_0001>

<bundles_post_ra>
// kernel: double_conv_forward.1
= control target key start
LH: loop header
LB: loop body
LE: loop exit
PB: predicated region body
PF: predicated region fallthrough
CT: control target
= control target key end

     0   :  { %12 = vsyncpa [#allocation4], 0  ;;  %s6031_s0 = inlined_call_operand.vmem [shape: bf16[2,256,36], index: 0, kind: input, shape index: {}]   ;;  %s6032_s1 = inlined_call_operand.vmem [shape: bf16[36,32], index: 1, kind: input, shape index: {}]   ;;  %s6033_s2 = inlined_call_operand.vmem [shape: f32[1,32], index: 2, kind: input, shape index: {}]   ;;  %s6034_s3 = inlined_call_operand.vmem [shape: f32[1,32], index: 3, kind: input, shape index: {}]   ;;  %s6035_s4 = inlined_call_operand.vmem [shape: bf16[9,32,32], index: 4, kind: input, shape index: {}]   ;;  %s6036_s5 = inlined_call_operand.vmem [shape: f32[1,32], index: 5, kind: input, shape index: {}]   ;;  %s6037_s6 = inlined_call_operand.vmem [shape: f32[1,32], index: 6, kind: input, shape index: {}]   ;;  %s6038_s7 = inlined_call_operand.hbm [shape: f32[2,16,16,32], index: 7, kind: output, shape index: {}]  }
   0x1   :  { %14 = vsyncpa [#allocation4 + $0x1], 0  ;;  %s4982_s24 = smov 0   ;;  %s4984_s25 = smov 0  }
   0x2   :  { %s4986_s26 = smov 0   ;;  %s4988_s27 = smov 0  }
   0x3 LB: > { %s5003_s28 = sadd.s32 4294967295, %s4936_s27   ;;  %s3748_s29 = sadd.s32 4294967294, %s4936_s27   ;;  %s4936_s27 = sphi %s4988_s27, %s6044_s27   ;;  %s4932_s26 = sphi %s4986_s26, %s6043_s26   ;;  %s4928_s25 = sphi %s4984_s25, %s6042_s25   ;;  %s4924_s24 = sphi %s4982_s24, %s6041_s24  }
   0x4   : > { %s5007_s30 = sadd.s32 1, %s4936_s27   ;;  %s179_s8 = sadd.s32 1, %s4932_s26 }
   0x5   : > { %s176_s9 = ssub.s32 %s4936_s27, %s5007_s30  ;;  %p189_p0 = scmp.ne.s32.totalorder %s4932_s26, %s4928_s25 }
   0x6   : > { %p177_p1 = scmp.eq.s32.totalorder %s176_s9, 0  ;;  %p190_p2 = scmp.eq.s32.totalorder %s5003_s28, 1 }
   0x7   : > { %p195_p3 = scmp.ne.s32.totalorder %s4928_s25, %s4924_s24  ;;  %p196_p4 = scmp.eq.s32.totalorder %s3748_s29, 1 }
   0x8   : > { %s5018_s10 = scalar_select %p177_p1, %s4932_s26, %s179_s8  }
   0x9   : > { %p5020_p5 = por %p190_p2, %p189_p0  ;;  %p5024_p6 = por %p196_p4, %p195_p3 }
   0xa   : > { %p3751_p7 = scmp.ge.s32.totalorder %s4936_s27, 1  ;;  %p240_p8 = scmp.lt.s32.totalorder %s4936_s27, 3 }
   0xc   : > { %p241_p9 = pnand %p3751_p7, %p240_p8 }
   0xd   : > { %v4837_v0 = vld [vmem:[%s6032_s1] sm:$0xff] (!%p241_p9)   ;;  %v4838_v1 = vld [vmem:[%s6032_s1 + $0x8] sm:$0xff] (!%p241_p9)   ;;  %p272_p10 = scmp.lt.s32.totalorder (!%p241_p9), %s5003_s28, 1  ;;  %v4839_v2 = vld [vmem:[%s6032_s1 + $0x10] ss:$0 sps:$4 sm:$0x33] (!%p241_p9)  }
   0xe   : > { %244 = sbr.rel (%p241_p9) target bundleno = 809 (0x329), region = 48  ;;  %4176 = vmatprep.subr.bf16.mxu0 (!%p241_p9), %v4837_v0  ;;  %vm459_vm0 = vcmask (!%p241_p9), 1041408   ;;  %vm410_vm1 = vcmask (!%p241_p9), 293888   ;;  %vm734_vm2 = vcmask (!%p241_p9), 261120   ;;  %v4938_v20 = vmov (!%p241_p9), 0.0   ;;  %v4856_v21 = vld [vmem:[%s6035_s4 + $0x10] sm:$0xff] (!%p241_p9)  }
   0xf   : > { %4177 = vmatpush3.bf16.msra.mxu0 (!%p241_p9), %v4837_v0  ;;  %v461_v4 = vsel (!%p241_p9), %vm459_vm0, %v4839_v2, 0  ;;  %744 = vst.msk [vmem:[#allocation2 + $0x48] sm:$0xff] (!%p241_p9), %vm734_vm2, %v4938_v20  ;;  %735 = vst.msk [vmem:[#allocation2] sm:$0xff] (!%p241_p9), %vm734_vm2, %v4938_v20  ;;  %v4857_v22 = vld [vmem:[%s6035_s4 + $0x40] sm:$0xff] (!%p241_p9)   ;;  %v4858_v23 = vld [vmem:[%s6035_s4 + $0x18] sm:$0xff] (!%p241_p9)   ;;  %s269_s22 = sand.u32 (!%p241_p9), 1, %s4928_s25  }
  0x10   : > { %4178 = vmatprep.subr.bf16.mxu0 (!%p241_p9), %v4838_v1  ;;  %736 = vst.msk [vmem:[#allocation2 + $0x8] sm:$0xff] (!%p241_p9), %vm734_vm2, %v4938_v20  ;;  %737 = vst.msk [vmem:[#allocation2 + $0x10] sm:$0xff] (!%p241_p9), %vm734_vm2, %v4938_v20  ;;  %4358 = vmatprep.subr.bf16.mxu1 (!%p241_p9), %v4857_v22  ;;  %v4859_v24 = vld [vmem:[%s6035_s4 + $0x48] sm:$0xff] (!%p241_p9)   ;;  %v5238_v28 = vld [vmem:[%s6035_s4 + $0x50] sm:$0xff] (!%p241_p9)   ;;  %s3752_s13 = sshll.u32 (!%p241_p9), %s269_s22, 8  ;;  %s3994_s15 = sshll.u32 (!%p241_p9), %s5003_s28, 12 }
  0x11   : > { %738 = vst.msk [vmem:[#allocation2 + $0x18] sm:$0xff] (!%p241_p9), %vm734_vm2, %v4938_v20  ;;  %739 = vst.msk [vmem:[#allocation2 + $0x20] sm:$0xff] (!%p241_p9), %vm734_vm2, %v4938_v20  ;;  %4359 = vmatpush3.bf16.msra.mxu1 (!%p241_p9), %v4857_v22  ;;  %v5244_v29 = vld [vmem:[%s6035_s4] sm:$0xff] (!%p241_p9)   ;;  %s5832_s14 = scalar_lea.vmem (!%p241_p9), [#allocation3], %s3752_s13  ;;  %s4939_s21 = smov (!%p241_p9), [#allocation3]  }
  0x12   : > { %740 = vst.msk [vmem:[#allocation2 + $0x28] sm:$0xff] (!%p241_p9), %vm734_vm2, %v4938_v20  ;;  %741 = vst.msk [vmem:[#allocation2 + $0x30] sm:$0xff] (!%p241_p9), %vm734_vm2, %v4938_v20  ;;  %4360 = vmatprep.subr.bf16.mxu1 (!%p241_p9), %v4859_v24  ;;  %v5250_v30 = vld [vmem:[%s6033_s2] ss:$0 sm:$0xff] (!%p241_p9)  ;;  %s3686_s16 = sshll.u32 (!%p241_p9), %s5832_s14, 4  ;;  %s5980_s16 = int_to_ptr.vmem [resolvable:$true] %s3686_s16 }
  0x13   : > { %4179 = vmatpush3.bf16.msra.mxu0 (!%p241_p9), %v4838_v1  ;;  %742 = vst.msk [vmem:[#allocation2 + $0x38] sm:$0xff] (!%p241_p9), %vm734_vm2, %v4938_v20  ;;  %743 = vst.msk [vmem:[#allocation2 + $0x40] sm:$0xff] (!%p241_p9), %vm734_vm2, %v4938_v20  ;;  %v5255_v32 = vld [vmem:[%s6034_s3] ss:$0 sm:$0xff] (!%p241_p9) }
  0x14   : > { %4794 = vmatprep.subr.msk.bf16.mxu0 (!%p241_p9), %vm459_vm0, %v4839_v2  ;;  %745 = vst.msk [vmem:[#allocation2 + $0x50] sm:$0xff] (!%p241_p9), %vm734_vm2, %v4938_v20  ;;  %746 = vst.msk [vmem:[#allocation2 + $0x58] sm:$0xff] (!%p241_p9), %vm734_vm2, %v4938_v20 }
  0x15   : > { %s273_s19 = scalar_select %p272_p10, %s5003_s28, 1  ;;  %747 = vst.msk [vmem:[#allocation2 + $0x60] sm:$0xff] %vm734_vm2, %v4938_v20  ;;  %748 = vst.msk [vmem:[#allocation2 + $0x68] sm:$0xff] %vm734_vm2, %v4938_v20  ;;  %4361 = vmatpush3.bf16.msra.mxu1 %v4859_v24 }
  0x16   : > { %749 = vst.msk [vmem:[#allocation2 + $0x70] sm:$0xff] %vm734_vm2, %v4938_v20  ;;  %750 = vst.msk [vmem:[#allocation2 + $0x78] sm:$0xff] %vm734_vm2, %v4938_v20  ;;  %4394 = vmatprep.subr.bf16.mxu1 %v5238_v28  ;;  %s5990_s28 = scalar_lea.sflag [#allocation4], %s269_s22 }
  0x17   : > { %s3993_s20 = sshll.u32 %s273_s19, 7  ;;  %4181 = vmatpush3.bf16.msra.mxu0 %v461_v4  ;;  %751 = vst.msk [vmem:[#allocation2 + $0x80] sm:$0xff] %vm734_vm2, %v4938_v20  ;;  %752 = vst.msk [vmem:[#allocation2 + $0x88] sm:$0xff] %vm734_vm2, %v4938_v20  ;;  %v892_v25 = vld [vmem:[#allocation2 + $0x8] sm:$0xff]  ;;  %v893_v26 = vld [vmem:[#allocation2 + $0x10] sm:$0xff]  ;;  %s5978_s19 = scalar_lea.hbm %s6038_s7, %s3994_s15 }
  0x18   : > { %s5044_s23 = scalar_lea.vmem %s6031_s0, %s3993_s20  ;;  %753 = vst.msk [vmem:[#allocation2 + $0x90] sm:$0xff] %vm734_vm2, %v4938_v20  ;;  %754 = vst.msk [vmem:[#allocation2 + $0x98] sm:$0xff] %vm734_vm2, %v4938_v20  ;;  %4214 = vmatprep.subr.bf16.mxu0 %v4856_v21  ;;  %v924_v27 = vpack.c.bf16 %v893_v26, %v892_v25  ;;  %s4874_s20 = scalar_lea.vmem %s5980_s16, 4096 }
  0x19   : > { %v4840_v3 = vld [vmem:[%s5044_s23] sm:$0xff]   ;;  %v4841_v5 = vld [vmem:[%s5044_s23 + $0x8] sm:$0xff]   ;;  %v4842_v6 = vld [vmem:[%s5044_s23 + $0x10] sm:$0xff]   ;;  %755 = vst.msk [vmem:[#allocation2 + $0xa0] sm:$0xff] %vm734_vm2, %v4938_v20  ;;  %p4875_p11 = scmp.ne.s32.totalorder %s5980_s16, %s4874_s20 }
  0x1a   : > { %4182 = vmatprep.mubr.msk.bf16.mxu0 %vm410_vm1, %v4840_v3  ;;  %v4843_v7 = vld [vmem:[%s5044_s23 + $0x18] sm:$0xff]   ;;  %v4844_v8 = vld [vmem:[%s5044_s23 + $0x20] sm:$0xff]   ;;  %v4845_v9 = vld [vmem:[%s5044_s23 + $0x28] sm:$0xff]   ;;  %756 = vst.msk [vmem:[#allocation2 + $0xa8] sm:$0xff] %vm734_vm2, %v4938_v20 }
  0x1b   : > { %4183 = vmatmul.mubr.msk.bf16.vlgmr.msra.gmra.mrb[0].mxu0 %vm410_vm1, %v4841_v5  ;;  %v4846_v10 = vld [vmem:[%s5044_s23 + $0x30] sm:$0xff]   ;;  %v4847_v11 = vld [vmem:[%s5044_s23 + $0x38] sm:$0xff]   ;;  %v4848_v12 = vld [vmem:[%s5044_s23 + $0x40] sm:$0xff]   ;;  %757 = vst.msk [vmem:[#allocation2 + $0xb0] sm:$0xff] %vm734_vm2, %v4938_v20  ;;  %p4876_p12 = pnand %p4875_p11, %p5020_p5 }
  0x1c   : > { %4186 = vmatprep.mubr.msk.bf16.mxu0 %vm410_vm1, %v4842_v6  ;;  %v4849_v13 = vld [vmem:[%s5044_s23 + $0x48] sm:$0xff]   ;;  %v4850_v14 = vld [vmem:[%s5044_s23 + $0x50] sm:$0xff]   ;;  %v4851_v15 = vld [vmem:[%s5044_s23 + $0x58] sm:$0xff]   ;;  %758 = vst.msk [vmem:[#allocation2 + $0xb8] sm:$0xff] %vm734_vm2, %v4938_v20  ;;  %4215 = vmatpush3.bf16.msra.mxu0 %v4856_v21 }
  0x1d   : > { %v4852_v16 = vld [vmem:[%s5044_s23 + $0x60] sm:$0xff]   ;;  %v4853_v17 = vld [vmem:[%s5044_s23 + $0x68] sm:$0xff]   ;;  %v4854_v18 = vld [vmem:[%s5044_s23 + $0x70] sm:$0xff]   ;;  %759 = vst.msk [vmem:[#allocation2 + $0xc0] sm:$0xff] %vm734_vm2, %v4938_v20  ;;  %4216 = vmatprep.subr.bf16.mxu0 %v4858_v23  ;;  %p4877_p13 = pneg %p4876_p12 }
  0x1e   : > { %v4855_v19 = vld [vmem:[%s5044_s23 + $0x78] sm:$0xff]   ;;  %760 = vst.msk [vmem:[#allocation2 + $0xc8] sm:$0xff] %vm734_vm2, %v4938_v20  ;;  %761 = vst.msk [vmem:[#allocation2 + $0xd0] sm:$0xff] %vm734_vm2, %v4938_v20  ;;  %s4878_s23 = sshll.u32 %s4939_s21, 4  ;;  %s4879_s23 = int_to_ptr.vmem [resolvable:$false] %s4878_s23 }
  0x1f   : > { %762 = vst.msk [vmem:[#allocation2 + $0xd8] sm:$0xff] %vm734_vm2, %v4938_v20  ;;  %763 = vst.msk [vmem:[#allocation2 + $0xe0] sm:$0xff] %vm734_vm2, %v4938_v20  ;;  %s4880_s29 = scalar_lea.vmem %s4879_s23, 8192  ;;  %p4881_p0 = scmp.lt.s32.totalorder %s5980_s16, %s4879_s23 }
  0x20   : > { %764 = vst.msk [vmem:[#allocation2 + $0xe8] sm:$0xff] %vm734_vm2, %v4938_v20  ;;  %765 = vst.msk [vmem:[#allocation2 + $0xf0] sm:$0xff] %vm734_vm2, %v4938_v20  ;;  %4217 = vmatpush3.bf16.msra.mxu0 %v4858_v23  ;;  %v5305_v23 = vld [vmem:[%s6035_s4 + $0x60] sm:$0xff]   ;;  %p4882_p1 = scmp.lt.s32.totalorder %s4880_s29, %s4874_s20 }
  0x21   : > { %766 = vst.msk [vmem:[#allocation2 + $0xf8] sm:$0xff] %vm734_vm2, %v4938_v20  ;;  %767 = vst.msk [vmem:[#allocation2 + $0x100] sm:$0xff] %vm734_vm2, %v4938_v20  ;;  %4250 = vmatprep.subr.bf16.mxu0 %v5244_v29 }
  0x22   : > { %768 = vst.msk [vmem:[#allocation2 + $0x108] sm:$0xff] %vm734_vm2, %v4938_v20  ;;  %769 = vst.msk [vmem:[#allocation2 + $0x110] sm:$0xff] %vm734_vm2, %v4938_v20  ;;  %p4883_p2 = por %p4882_p1, %p4881_p0 }
  0x23   : > { %4187 = vmatmul.mubr.msk.bf16.gmra.mrb[4].mxu0 %vm410_vm1, %v4843_v7  ;;  %770 = vst.msk [vmem:[#allocation2 + $0x118] sm:$0xff] %vm734_vm2, %v4938_v20  ;;  %771 = vst.msk [vmem:[#allocation2 + $0x120] sm:$0xff] %vm734_vm2, %v4938_v20 }
  0x24   : > { %4190 = vmatprep.mubr.msk.bf16.mxu0 %vm410_vm1, %v4844_v8  ;;  %772 = vst.msk [vmem:[#allocation2 + $0x128] sm:$0xff] %vm734_vm2, %v4938_v20  ;;  %773 = vst.msk [vmem:[#allocation2 + $0x130] sm:$0xff] %vm734_vm2, %v4938_v20  ;;  %p4884_p3 = pnand %p4883_p2, %p4877_p13 }
  0x25   : > { %774 = vst.msk [vmem:[#allocation2 + $0x138] sm:$0xff] %vm734_vm2, %v4938_v20  ;;  %775 = vst.msk [vmem:[#allocation2 + $0x140] sm:$0xff] %vm734_vm2, %v4938_v20 }
  0x26   : > { %776 = vst.msk [vmem:[#allocation2 + $0x148] sm:$0xff] %vm734_vm2, %v4938_v20  ;;  %777 = vst.msk [vmem:[#allocation2 + $0x150] sm:$0xff] %vm734_vm2, %v4938_v20 }
  0x27   : > { %778 = vst.msk [vmem:[#allocation2 + $0x158] sm:$0xff] %vm734_vm2, %v4938_v20  ;;  %779 = vst.msk [vmem:[#allocation2 + $0x160] sm:$0xff] %vm734_vm2, %v4938_v20 }
  0x28   : > { %780 = vst.msk [vmem:[#allocation2 + $0x168] sm:$0xff] %vm734_vm2, %v4938_v20  ;;  %781 = vst.msk [vmem:[#allocation2 + $0x170] sm:$0xff] %vm734_vm2, %v4938_v20 }
  0x29   : > { %782 = vst.msk [vmem:[#allocation2 + $0x178] sm:$0xff] %vm734_vm2, %v4938_v20  ;;  %783 = vst.msk [vmem:[#allocation2 + $0x180] sm:$0xff] %vm734_vm2, %v4938_v20 }
  0x2a   : > { %784 = vst.msk [vmem:[#allocation2 + $0x188] sm:$0xff] %vm734_vm2, %v4938_v20  ;;  %785 = vst.msk [vmem:[#allocation2 + $0x190] sm:$0xff] %vm734_vm2, %v4938_v20 }
  0x2b   : > { %4191 = vmatmul.mubr.msk.bf16.gmra.mrb[8].mxu0 %vm410_vm1, %v4845_v9  ;;  %786 = vst.msk [vmem:[#allocation2 + $0x198] sm:$0xff] %vm734_vm2, %v4938_v20  ;;  %787 = vst.msk [vmem:[#allocation2 + $0x1a0] sm:$0xff] %vm734_vm2, %v4938_v20 }
  0x2c   : > { %4194 = vmatprep.mubr.msk.bf16.mxu0 %vm410_vm1, %v4846_v10  ;;  %788 = vst.msk [vmem:[#allocation2 + $0x1a8] sm:$0xff] %vm734_vm2, %v4938_v20  ;;  %789 = vst.msk [vmem:[#allocation2 + $0x1b0] sm:$0xff] %vm734_vm2, %v4938_v20 }
  0x2d   : > { %790 = vst.msk [vmem:[#allocation2 + $0x1b8] sm:$0xff] %vm734_vm2, %v4938_v20  ;;  %791 = vst.msk [vmem:[#allocation2 + $0x1c0] sm:$0xff] %vm734_vm2, %v4938_v20 }
  0x2e   : > { %792 = vst.msk [vmem:[#allocation2 + $0x1c8] sm:$0xff] %vm734_vm2, %v4938_v20  ;;  %793 = vst.msk [vmem:[#allocation2 + $0x1d0] sm:$0xff] %vm734_vm2, %v4938_v20 }
  0x2f   : > { %794 = vst.msk [vmem:[#allocation2 + $0x1d8] sm:$0xff] %vm734_vm2, %v4938_v20  ;;  %795 = vst.msk [vmem:[#allocation2 + $0x1e0] sm:$0xff] %vm734_vm2, %v4938_v20 }
  0x30   : > { %796 = vst.msk [vmem:[#allocation2 + $0x1e8] sm:$0xff] %vm734_vm2, %v4938_v20  ;;  %797 = vst.msk [vmem:[#allocation2 + $0x1f0] sm:$0xff] %vm734_vm2, %v4938_v20 }
  0x31   : > { %798 = vst.msk [vmem:[#allocation2 + $0x1f8] sm:$0xff] %vm734_vm2, %v4938_v20  ;;  %799 = vst.msk [vmem:[#allocation2 + $0x200] sm:$0xff] %vm734_vm2, %v4938_v20 }
  0x32   : > { %800 = vst.msk [vmem:[#allocation2 + $0x208] sm:$0xff] %vm734_vm2, %v4938_v20  ;;  %801 = vst.msk [vmem:[#allocation2 + $0x210] sm:$0xff] %vm734_vm2, %v4938_v20 }
  0x33   : > { %4195 = vmatmul.mubr.msk.bf16.gmra.mrb[12].mxu0 %vm410_vm1, %v4847_v11  ;;  %802 = vst.msk [vmem:[#allocation2 + $0x218] sm:$0xff] %vm734_vm2, %v4938_v20  ;;  %803 = vst.msk [vmem:[#allocation2 + $0x220] sm:$0xff] %vm734_vm2, %v4938_v20 }
  0x34   : > { %4198 = vmatprep.mubr.msk.bf16.mxu0 %vm410_vm1, %v4848_v12  ;;  %804 = vst.msk [vmem:[#allocation2 + $0x228] sm:$0xff] %vm734_vm2, %v4938_v20  ;;  %805 = vst.msk [vmem:[#allocation2 + $0x230] sm:$0xff] %vm734_vm2, %v4938_v20 }
  0x35   : > { %806 = vst.msk [vmem:[#allocation2 + $0x238] sm:$0xff] %vm734_vm2, %v4938_v20 }
  0x3b   : > { %4199 = vmatmul.mubr.msk.bf16.gmra.mrb[16].mxu0 %vm410_vm1, %v4849_v13 }
  0x3c   : > { %4202 = vmatprep.mubr.msk.bf16.mxu0 %vm410_vm1, %v4850_v14  ;;  %v4861_v14 = vld [vmem:[%s6035_s4 + $0x58] sm:$0xff]  }
  0x43   : > { %4203 = vmatmul.mubr.msk.bf16.gmra.mrb[20].mxu0 %vm410_vm1, %v4851_v15  ;;  %v4863_v15 = vld [vmem:[%s6035_s4 + $0x8] sm:$0xff]  }
  0x44   : > { %4206 = vmatprep.mubr.msk.bf16.mxu0 %vm410_vm1, %v4852_v16 }
  0x4b   : > { %4207 = vmatmul.mubr.msk.bf16.gmra.mrb[24].mxu0 %vm410_vm1, %v4853_v17 }
  0x4c   : > { %4210 = vmatprep.mubr.msk.bf16.mxu0 %vm410_vm1, %v4854_v18 }
  0x53   : > { %4211 = vmatmul.mubr.msk.bf16.gmra.mrb[28].mxu0 %vm410_vm1, %v4855_v19 }
  0x54   : > { %4218 = vmatprep.mubr.msk.bf16.mxu0 %vm734_vm2, %v924_v27 }
  0xee   : > { %v4184_v31 = vpop.f32.mrb[0].mxu0 }
  0xef   : > { %v633_v33 = vmul.f32 %v4184_v31, %v5250_v30  ;;  %v497_v34 = vpop.f32.mrb[1].mxu0 }
  0xf0   : > { %v631_v35 = vmul.f32 %v5250_v30, %v497_v34  ;;  %v4185_v36 = vpop.f32.mrb[2].mxu0 }
  0xf1   : > { %v672_v37 = vadd.f32 %v5255_v32, %v633_v33  ;;  %v634_v38 = vmul.f32 %v4185_v36, %v5250_v30  ;;  %v500_v39 = vpop.f32.mrb[3].mxu0 }
  0xf2   : > { %v670_v40 = vadd.f32 %v5255_v32, %v631_v35  ;;  %v632_v41 = vmul.f32 %v5250_v30, %v500_v39 }
  0xf3   : > { %v704_v42 = vmax.f32 %v672_v37, 0.0  ;;  %v673_v43 = vadd.f32 %v5255_v32, %v634_v38  ;;  %v5315_v37 = vld [vmem:[%s6035_s4 + $0x20] sm:$0xff]  }
  0xf4   : > { %v702_v44 = vmax.f32 %v670_v40, 0.0  ;;  %v671_v45 = vadd.f32 %v5255_v32, %v632_v41 }
  0xf5   : > { %810 = vst.msk [vmem:[#allocation2 + $0x48] sm:$0xff] %vm734_vm2, %v704_v42  ;;  %v705_v46 = vmax.f32 %v673_v43, 0.0 }
  0xf6   : > { %808 = vst.msk [vmem:[#allocation2 + $0x28] sm:$0xff] %vm734_vm2, %v702_v44  ;;  %v703_v47 = vmax.f32 %v671_v45, 0.0  ;;  %v4188_v48 = vpop.f32.mrb[4].mxu0 }
  0xf7   : > { %811 = vst.msk [vmem:[#allocation2 + $0x50] sm:$0xff] %vm734_vm2, %v705_v46  ;;  %v637_v49 = vmul.f32 %v4188_v48, %v5250_v30  ;;  %v513_v50 = vpop.f32.mrb[5].mxu0 }
  0xf8   : > { %809 = vst.msk [vmem:[#allocation2 + $0x30] sm:$0xff] %vm734_vm2, %v703_v47  ;;  %v635_v51 = vmul.f32 %v5250_v30, %v513_v50  ;;  %v4189_v52 = vpop.f32.mrb[6].mxu0 }
  0xf9   : > { %v676_v53 = vadd.f32 %v5255_v32, %v637_v49  ;;  %v638_v54 = vmul.f32 %v4189_v52, %v5250_v30  ;;  %v516_v55 = vpop.f32.mrb[7].mxu0 }
  0xfa   : > { %v674_v56 = vadd.f32 %v5255_v32, %v635_v51  ;;  %v636_v57 = vmul.f32 %v5250_v30, %v516_v55 }
  0xfb   : > { %v708_v58 = vmax.f32 %v676_v53, 0.0  ;;  %v677_v59 = vadd.f32 %v5255_v32, %v638_v54 }
  0xfc   : > { %v706_v60 = vmax.f32 %v674_v56, 0.0  ;;  %v675_v61 = vadd.f32 %v5255_v32, %v636_v57  ;;  %v896_v9 = vld [vmem:[#allocation2 + $0x48] sm:$0xff] }
  0xfd   : > { %814 = vst.msk [vmem:[#allocation2 + $0x88] sm:$0xff] %vm734_vm2, %v708_v58  ;;  %v709_v62 = vmax.f32 %v677_v59, 0.0  ;;  %v894_v4 = vld [vmem:[#allocation2 + $0x28] sm:$0xff] }
  0xfe   : > { %812 = vst.msk [vmem:[#allocation2 + $0x68] sm:$0xff] %vm734_vm2, %v706_v60  ;;  %v707_v63 = vmax.f32 %v675_v61, 0.0  ;;  %v4192_v0 = vpop.f32.mrb[8].mxu0  ;;  %v897_v1 = vld [vmem:[#allocation2 + $0x50] sm:$0xff] }
  0xff   : > { %815 = vst.msk [vmem:[#allocation2 + $0x90] sm:$0xff] %vm734_vm2, %v709_v62  ;;  %v641_v2 = vmul.f32 %v4192_v0, %v5250_v30  ;;  %v529_v3 = vpop.f32.mrb[9].mxu0  ;;  %v895_v5 = vld [vmem:[#allocation2 + $0x30] sm:$0xff]  ;;  %v926_v13 = vpack.c.bf16 %v897_v1, %v896_v9 }
 0x100   : > { %813 = vst.msk [vmem:[#allocation2 + $0x70] sm:$0xff] %vm734_vm2, %v707_v63  ;;  %v639_v6 = vmul.f32 %v5250_v30, %v529_v3  ;;  %v4193_v7 = vpop.f32.mrb[10].mxu0  ;;  %v925_v8 = vpack.c.bf16 %v895_v5, %v894_v4 }
 0x101   : > { %v680_v10 = vadd.f32 %v5255_v32, %v641_v2  ;;  %v642_v11 = vmul.f32 %v4193_v7, %v5250_v30  ;;  %v532_v12 = vpop.f32.mrb[11].mxu0 }
 0x102   : > { %v678_v16 = vadd.f32 %v5255_v32, %v639_v6  ;;  %v640_v17 = vmul.f32 %v5250_v30, %v532_v12  ;;  %4219 = vmatmul.mubr.msk.bf16.vlgmr.msra.gmra.mrb[32].mxu0 %vm734_vm2, %v925_v8  ;;  %4362 = vmatprep.mubr.msk.bf16.mxu1 %vm734_vm2, %v925_v8 }
 0x103   : > { %v712_v18 = vmax.f32 %v680_v10, 0.0  ;;  %v681_v19 = vadd.f32 %v5255_v32, %v642_v11  ;;  %4222 = vmatprep.mubr.msk.bf16.mxu0 %vm734_vm2, %v926_v13  ;;  %4363 = vmatmul.mubr.msk.bf16.vlgmr.msra.gmra.mrb[0].mxu1 %vm734_vm2, %v926_v13 }
 0x104   : > { %v710_v20 = vmax.f32 %v678_v16, 0.0  ;;  %v679_v21 = vadd.f32 %v5255_v32, %v640_v17  ;;  %4395 = vmatpush3.bf16.msra.mxu1 %v5238_v28  ;;  %4251 = vmatpush3.bf16.msra.mxu0 %v5244_v29  ;;  %v900_v36 = vld [vmem:[#allocation2 + $0x88] sm:$0xff] }
 0x105   : > { %818 = vst.msk [vmem:[#allocation2 + $0xc8] sm:$0xff] %vm734_vm2, %v712_v18  ;;  %v713_v22 = vmax.f32 %v681_v19, 0.0  ;;  %4396 = vmatprep.subr.bf16.mxu1 %v4861_v14  ;;  %4252 = vmatprep.subr.bf16.mxu0 %v4863_v15  ;;  %v898_v29 = vld [vmem:[#allocation2 + $0x68] sm:$0xff] }
 0x106   : > { %816 = vst.msk [vmem:[#allocation2 + $0xa8] sm:$0xff] %vm734_vm2, %v710_v20  ;;  %v711_v24 = vmax.f32 %v679_v21, 0.0  ;;  %v4196_v25 = vpop.f32.mrb[12].mxu0  ;;  %v901_v26 = vld [vmem:[#allocation2 + $0x90] sm:$0xff] }
 0x107   : > { %819 = vst.msk [vmem:[#allocation2 + $0xd0] sm:$0xff] %vm734_vm2, %v713_v22  ;;  %v645_v27 = vmul.f32 %v4196_v25, %v5250_v30  ;;  %v545_v28 = vpop.f32.mrb[13].mxu0  ;;  %v899_v31 = vld [vmem:[#allocation2 + $0x70] sm:$0xff]  ;;  %v928_v41 = vpack.c.bf16 %v901_v26, %v900_v36 }
 0x108   : > { %817 = vst.msk [vmem:[#allocation2 + $0xb0] sm:$0xff] %vm734_vm2, %v711_v24  ;;  %v643_v33 = vmul.f32 %v5250_v30, %v545_v28  ;;  %v4197_v34 = vpop.f32.mrb[14].mxu0  ;;  %v927_v35 = vpack.c.bf16 %v899_v31, %v898_v29  ;;  %4397 = vmatpush3.bf16.msra.mxu1 %v4861_v14  ;;  %4253 = vmatpush3.bf16.msra.mxu0 %v4863_v15 }
 0x109   : > { %v684_v38 = vadd.f32 %v5255_v32, %v645_v27  ;;  %v646_v39 = vmul.f32 %v4197_v34, %v5250_v30  ;;  %v548_v40 = vpop.f32.mrb[15].mxu0  ;;  %4430 = vmatprep.subr.bf16.mxu1 %v5305_v23  ;;  %4286 = vmatprep.subr.bf16.mxu0 %v5315_v37 }
 0x10a   : > { %v682_v42 = vadd.f32 %v5255_v32, %v643_v33  ;;  %v644_v43 = vmul.f32 %v5250_v30, %v548_v40  ;;  %4223 = vmatmul.mubr.msk.bf16.gmra.mrb[36].mxu0 %vm734_vm2, %v927_v35  ;;  %4366 = vmatprep.mubr.msk.bf16.mxu1 %vm734_vm2, %v927_v35 }
 0x10b   : > { %v716_v44 = vmax.f32 %v684_v38, 0.0  ;;  %v685_v45 = vadd.f32 %v5255_v32, %v646_v39  ;;  %4226 = vmatprep.mubr.msk.bf16.mxu0 %vm734_vm2, %v928_v41  ;;  %4367 = vmatmul.mubr.msk.bf16.gmra.mrb[4].mxu1 %vm734_vm2, %v928_v41 }
 0x10c   : > { %v714_v46 = vmax.f32 %v682_v42, 0.0  ;;  %v683_v47 = vadd.f32 %v5255_v32, %v644_v43  ;;  %v904_v59 = vld [vmem:[#allocation2 + $0xc8] sm:$0xff] }
 0x10d   : > { %822 = vst.msk [vmem:[#allocation2 + $0x108] sm:$0xff] %vm734_vm2, %v716_v44  ;;  %v717_v48 = vmax.f32 %v685_v45, 0.0  ;;  %v902_v54 = vld [vmem:[#allocation2 + $0xa8] sm:$0xff] }
 0x10e   : > { %820 = vst.msk [vmem:[#allocation2 + $0xe8] sm:$0xff] %vm734_vm2, %v714_v46  ;;  %v715_v49 = vmax.f32 %v683_v47, 0.0  ;;  %v4200_v50 = vpop.f32.mrb[16].mxu0  ;;  %v905_v51 = vld [vmem:[#allocation2 + $0xd0] sm:$0xff] }
 0x10f   : > { %823 = vst.msk [vmem:[#allocation2 + $0x110] sm:$0xff] %vm734_vm2, %v717_v48  ;;  %v649_v52 = vmul.f32 %v4200_v50, %v5250_v30  ;;  %v561_v53 = vpop.f32.mrb[17].mxu0  ;;  %v903_v55 = vld [vmem:[#allocation2 + $0xb0] sm:$0xff]  ;;  %v5339_v63 = vpack.c.bf16 %v905_v51, %v904_v59 }
 0x110   : > { %821 = vst.msk [vmem:[#allocation2 + $0xf0] sm:$0xff] %vm734_vm2, %v715_v49  ;;  %v647_v56 = vmul.f32 %v5250_v30, %v561_v53  ;;  %v4201_v57 = vpop.f32.mrb[18].mxu0  ;;  %v5335_v58 = vpack.c.bf16 %v903_v55, %v902_v54 }
 0x111   : > { %v688_v60 = vadd.f32 %v5255_v32, %v649_v52  ;;  %v650_v61 = vmul.f32 %v4201_v57, %v5250_v30  ;;  %v564_v62 = vpop.f32.mrb[19].mxu0 }
 0x112   : > { %v686_v0 = vadd.f32 %v5255_v32, %v647_v56  ;;  %v648_v1 = vmul.f32 %v5250_v30, %v564_v62  ;;  %4227 = vmatmul.mubr.msk.bf16.gmra.mrb[40].mxu0 %vm734_vm2, %v5335_v58  ;;  %4370 = vmatprep.mubr.msk.bf16.mxu1 %vm734_vm2, %v5335_v58 }
 0x113   : > { %v720_v2 = vmax.f32 %v688_v60, 0.0  ;;  %v689_v3 = vadd.f32 %v5255_v32, %v650_v61  ;;  %4230 = vmatprep.mubr.msk.bf16.mxu0 %vm734_vm2, %v5339_v63  ;;  %4371 = vmatmul.mubr.msk.bf16.gmra.mrb[8].mxu1 %vm734_vm2, %v5339_v63 }
 0x114   : > { %v718_v4 = vmax.f32 %v686_v0, 0.0  ;;  %v687_v5 = vadd.f32 %v5255_v32, %v648_v1  ;;  %v908_v17 = vld [vmem:[#allocation2 + $0x108] sm:$0xff] }
 0x115   : > { %826 = vst.msk [vmem:[#allocation2 + $0x148] sm:$0xff] %vm734_vm2, %v720_v2  ;;  %v721_v6 = vmax.f32 %v689_v3, 0.0  ;;  %v906_v12 = vld [vmem:[#allocation2 + $0xe8] sm:$0xff] }
 0x116   : > { %824 = vst.msk [vmem:[#allocation2 + $0x128] sm:$0xff] %vm734_vm2, %v718_v4  ;;  %v719_v7 = vmax.f32 %v687_v5, 0.0  ;;  %v4204_v8 = vpop.f32.mrb[20].mxu0  ;;  %v909_v9 = vld [vmem:[#allocation2 + $0x110] sm:$0xff] }
 0x117   : > { %827 = vst.msk [vmem:[#allocation2 + $0x150] sm:$0xff] %vm734_vm2, %v721_v6  ;;  %v653_v10 = vmul.f32 %v4204_v8, %v5250_v30  ;;  %v577_v11 = vpop.f32.mrb[21].mxu0  ;;  %v907_v13 = vld [vmem:[#allocation2 + $0xf0] sm:$0xff]  ;;  %v5363_v21 = vpack.c.bf16 %v909_v9, %v908_v17 }
 0x118   : > { %825 = vst.msk [vmem:[#allocation2 + $0x130] sm:$0xff] %vm734_vm2, %v719_v7  ;;  %v651_v14 = vmul.f32 %v5250_v30, %v577_v11  ;;  %v4205_v15 = vpop.f32.mrb[22].mxu0  ;;  %v5359_v16 = vpack.c.bf16 %v907_v13, %v906_v12 }
 0x119   : > { %v692_v18 = vadd.f32 %v5255_v32, %v653_v10  ;;  %v654_v19 = vmul.f32 %v4205_v15, %v5250_v30  ;;  %v580_v20 = vpop.f32.mrb[23].mxu0 }
 0x11a   : > { %v690_v22 = vadd.f32 %v5255_v32, %v651_v14  ;;  %v652_v24 = vmul.f32 %v5250_v30, %v580_v20  ;;  %4231 = vmatmul.mubr.msk.bf16.gmra.mrb[44].mxu0 %vm734_vm2, %v5359_v16  ;;  %4374 = vmatprep.mubr.msk.bf16.mxu1 %vm734_vm2, %v5359_v16 }
 0x11b   : > { %v724_v25 = vmax.f32 %v692_v18, 0.0  ;;  %v693_v26 = vadd.f32 %v5255_v32, %v654_v19  ;;  %4234 = vmatprep.mubr.msk.bf16.mxu0 %vm734_vm2, %v5363_v21  ;;  %4375 = vmatmul.mubr.msk.bf16.gmra.mrb[12].mxu1 %vm734_vm2, %v5363_v21 }
 0x11c   : > { %v722_v27 = vmax.f32 %v690_v22, 0.0  ;;  %v691_v28 = vadd.f32 %v5255_v32, %v652_v24  ;;  %v912_v43 = vld [vmem:[#allocation2 + $0x148] sm:$0xff] }
 0x11d   : > { %830 = vst.msk [vmem:[#allocation2 + $0x188] sm:$0xff] %vm734_vm2, %v724_v25  ;;  %v725_v29 = vmax.f32 %v693_v26, 0.0  ;;  %v910_v38 = vld [vmem:[#allocation2 + $0x128] sm:$0xff] }
 0x11e   : > { %828 = vst.msk [vmem:[#allocation2 + $0x168] sm:$0xff] %vm734_vm2, %v722_v27  ;;  %v723_v31 = vmax.f32 %v691_v28, 0.0  ;;  %v4208_v33 = vpop.f32.mrb[24].mxu0  ;;  %v913_v34 = vld [vmem:[#allocation2 + $0x150] sm:$0xff] }
 0x11f   : > { %831 = vst.msk [vmem:[#allocation2 + $0x190] sm:$0xff] %vm734_vm2, %v725_v29  ;;  %v657_v35 = vmul.f32 %v4208_v33, %v5250_v30  ;;  %v593_v36 = vpop.f32.mrb[25].mxu0  ;;  %v911_v39 = vld [vmem:[#allocation2 + $0x130] sm:$0xff]  ;;  %v5387_v47 = vpack.c.bf16 %v913_v34, %v912_v43  ;;  %v842_v43 = vld [vmem:[#allocation2 + $0x27] sm:$0xff] }
 0x120   : > { %829 = vst.msk [vmem:[#allocation2 + $0x170] sm:$0xff] %vm734_vm2, %v723_v31  ;;  %v655_v40 = vmul.f32 %v5250_v30, %v593_v36  ;;  %v4209_v41 = vpop.f32.mrb[26].mxu0  ;;  %v5383_v42 = vpack.c.bf16 %v911_v39, %v910_v38  ;;  %v841_v24 = vld [vmem:[#allocation2 + $0xf] sm:$0xff] }
 0x121   : > { %v696_v44 = vadd.f32 %v5255_v32, %v657_v35  ;;  %v658_v45 = vmul.f32 %v4209_v41, %v5250_v30  ;;  %v596_v46 = vpop.f32.mrb[27].mxu0  ;;  %v2305_v26 = vld [vmem:[#allocation2 + $0x29] sm:$0xff]  ;;  %v2306_v29 = vld [vmem:[#allocation2 + $0x31] sm:$0xff] }
 0x122   : > { %v694_v48 = vadd.f32 %v5255_v32, %v655_v40  ;;  %v656_v49 = vmul.f32 %v5250_v30, %v596_v46  ;;  %4235 = vmatmul.mubr.msk.bf16.gmra.mrb[48].mxu0 %vm734_vm2, %v5383_v42  ;;  %4378 = vmatprep.mubr.msk.bf16.mxu1 %vm734_vm2, %v5383_v42  ;;  %v5449_v36 = vpack.c.bf16 %v2306_v29, %v2305_v26  ;;  %v843_v38 = vld [vmem:[#allocation2 + $0x2f] sm:$0xff]  ;;  %v856_v29 = vld [vmem:[#allocation2 + $0x107] sm:$0xff] }
 0x123   : > { %v728_v50 = vmax.f32 %v696_v44, 0.0  ;;  %v697_v51 = vadd.f32 %v5255_v32, %v658_v45  ;;  %4238 = vmatprep.mubr.msk.bf16.mxu0 %vm734_vm2, %v5387_v47  ;;  %4379 = vmatmul.mubr.msk.bf16.gmra.mrb[16].mxu1 %vm734_vm2, %v5387_v47  ;;  %v845_v39 = vld [vmem:[#allocation2 + $0x4f] sm:$0xff]  ;;  %v5456_v46 = vpack.c.bf16 %v843_v38, %v842_v43 }
 0x124   : > { %v726_v52 = vmax.f32 %v694_v48, 0.0  ;;  %v695_v53 = vadd.f32 %v5255_v32, %v656_v49  ;;  %v916_v3 = vld [vmem:[#allocation2 + $0x188] sm:$0xff]  ;;  %v2308_v41 = vld [vmem:[#allocation2 + $0x51] sm:$0xff] }
 0x125   : > { %834 = vst.msk [vmem:[#allocation2 + $0x1c8] sm:$0xff] %vm734_vm2, %v728_v50  ;;  %v729_v54 = vmax.f32 %v697_v51, 0.0  ;;  %v914_v61 = vld [vmem:[#allocation2 + $0x168] sm:$0xff]  ;;  %v2310_v45 = vld [vmem:[#allocation2 + $0x71] sm:$0xff] }
 0x126   : > { %832 = vst.msk [vmem:[#allocation2 + $0x1a8] sm:$0xff] %vm734_vm2, %v726_v52  ;;  %v727_v55 = vmax.f32 %v695_v53, 0.0  ;;  %v4212_v56 = vpop.f32.mrb[28].mxu0  ;;  %v917_v57 = vld [vmem:[#allocation2 + $0x190] sm:$0xff]  ;;  %v844_v48 = vld [vmem:[#allocation2 + $0x47] sm:$0xff] }
 0x127   : > { %835 = vst.msk [vmem:[#allocation2 + $0x1d0] sm:$0xff] %vm734_vm2, %v729_v54  ;;  %v661_v59 = vmul.f32 %v4212_v56, %v5250_v30  ;;  %v609_v60 = vpop.f32.mrb[29].mxu0  ;;  %v915_v62 = vld [vmem:[#allocation2 + $0x170] sm:$0xff]  ;;  %v5411_v7 = vpack.c.bf16 %v917_v57, %v916_v3  ;;  %v5458_v49 = vpack.c.bf16 %v845_v39, %v844_v48  ;;  %v4865_v51 = vld [vmem:[%s6035_s4 + $0x68] sm:$0xff]  }
 0x128   : > { %833 = vst.msk [vmem:[#allocation2 + $0x1b0] sm:$0xff] %vm734_vm2, %v727_v55  ;;  %v659_v0 = vmul.f32 %v5250_v30, %v609_v60  ;;  %v4213_v1 = vpop.f32.mrb[30].mxu0  ;;  %v5407_v2 = vpack.c.bf16 %v915_v62, %v914_v61  ;;  %v2307_v40 = vld [vmem:[#allocation2 + $0x49] sm:$0xff]  ;;  %v2314_v62 = vld [vmem:[#allocation2 + $0xb1] sm:$0xff] }
 0x129   : > { %v700_v4 = vadd.f32 %v5255_v32, %v661_v59  ;;  %v662_v5 = vmul.f32 %v4213_v1, %v5250_v30  ;;  %v612_v6 = vpop.f32.mrb[31].mxu0  ;;  %v2309_v44 = vld [vmem:[#allocation2 + $0x69] sm:$0xff]  ;;  %v5460_v50 = vpack.c.bf16 %v2308_v41, %v2307_v40  ;;  %v2312_v59 = vld [vmem:[#allocation2 + $0x91] sm:$0xff] }
 0x12a   : > { %v698_v8 = vadd.f32 %v5255_v32, %v659_v0  ;;  %v660_v9 = vmul.f32 %v5250_v30, %v612_v6  ;;  %4239 = vmatmul.mubr.msk.bf16.gmra.mrb[52].mxu0 %vm734_vm2, %v5407_v2  ;;  %4382 = vmatprep.mubr.msk.bf16.mxu1 %vm734_vm2, %v5407_v2  ;;  %v5467_v52 = vpack.c.bf16 %v2310_v45, %v2309_v44  ;;  %v4867_v53 = vld [vmem:[%s6035_s4 + $0x28] sm:$0xff]   ;;  %v5483_v56 = vld [vmem:[%s6035_s4 + $0x70] sm:$0xff]  }
 0x12b   : > { %v732_v10 = vmax.f32 %v700_v4, 0.0  ;;  %v701_v11 = vadd.f32 %v5255_v32, %v662_v5  ;;  %4242 = vmatprep.mubr.msk.bf16.mxu0 %vm734_vm2, %v5411_v7  ;;  %4383 = vmatmul.mubr.msk.bf16.gmra.mrb[20].mxu1 %vm734_vm2, %v5411_v7  ;;  %v847_v54 = vld [vmem:[#allocation2 + $0x6f] sm:$0xff]  ;;  %v846_v60 = vld [vmem:[#allocation2 + $0x67] sm:$0xff] }
 0x12c   : > { %v730_v12 = vmax.f32 %v698_v8, 0.0  ;;  %v699_v13 = vadd.f32 %v5255_v32, %v660_v9  ;;  %v920_v20 = vld [vmem:[#allocation2 + $0x1c8] sm:$0xff]  ;;  %v5490_v0 = vpack.c.bf16 %v847_v54, %v846_v60  ;;  %v2316_v9 = vld [vmem:[#allocation2 + $0xd1] sm:$0xff] }
 0x12d   : > { %838 = vst.msk [vmem:[#allocation2 + $0x208] sm:$0xff] %vm734_vm2, %v732_v10  ;;  %v733_v30 = vmax.f32 %v701_v11, 0.0  ;;  %v918_v17 = vld [vmem:[#allocation2 + $0x1a8] sm:$0xff]  ;;  %v2324_v43 = vld [vmem:[#allocation2 + $0x151] sm:$0xff] }
 0x12e   : > { %836 = vst.msk [vmem:[#allocation2 + $0x1e8] sm:$0xff] %vm734_vm2, %v730_v12  ;;  %v731_v14 = vmax.f32 %v699_v13, 0.0  ;;  %v921_v15 = vld [vmem:[#allocation2 + $0x1d0] sm:$0xff]  ;;  %v840_v32 = vld [vmem:[#allocation2 + $0x7] sm:$0xff] }
 0x12f   : > { %839 = vst.msk [vmem:[#allocation2 + $0x210] sm:$0xff] %vm734_vm2, %v733_v30  ;;  %v919_v18 = vld [vmem:[#allocation2 + $0x1b0] sm:$0xff]  ;;  %v5431_v22 = vpack.c.bf16 %v921_v15, %v920_v20  ;;  %v872_v31 = vpack.c.bf16 %v841_v24, %v840_v32  ;;  %v848_v1 = vld [vmem:[#allocation2 + $0x87] sm:$0xff] }
 0x130   : > { %837 = vst.msk [vmem:[#allocation2 + $0x1f0] sm:$0xff] %vm734_vm2, %v731_v14  ;;  %v5429_v19 = vpack.c.bf16 %v919_v18, %v918_v17  ;;  %v849_v55 = vld [vmem:[#allocation2 + $0x8f] sm:$0xff]  ;;  %v850_v10 = vld [vmem:[#allocation2 + $0xa7] sm:$0xff] }
 0x131   : > { %v2311_v57 = vld [vmem:[#allocation2 + $0x89] sm:$0xff]  ;;  %v2318_v12 = vld [vmem:[#allocation2 + $0xf1] sm:$0xff] }
 0x132   : > { %4243 = vmatmul.mubr.msk.bf16.gmra.mrb[56].mxu0 %vm734_vm2, %v5429_v19  ;;  %4386 = vmatprep.mubr.msk.bf16.mxu1 %vm734_vm2, %v5429_v19  ;;  %v2313_v61 = vld [vmem:[#allocation2 + $0xa9] sm:$0xff]  ;;  %v5494_v3 = vpack.c.bf16 %v2312_v59, %v2311_v57  ;;  %v2320_v24 = vld [vmem:[#allocation2 + $0x111] sm:$0xff] }
 0x133   : > { %4246 = vmatprep.mubr.msk.bf16.mxu0 %vm734_vm2, %v5431_v22  ;;  %4387 = vmatmul.mubr.msk.bf16.gmra.mrb[24].mxu1 %vm734_vm2, %v5431_v22  ;;  %v5499_v4 = vpack.c.bf16 %v2314_v62, %v2313_v61  ;;  %v851_v5 = vld [vmem:[#allocation2 + $0xaf] sm:$0xff]  ;;  %v852_v30 = vld [vmem:[#allocation2 + $0xc7] sm:$0xff] }
 0x134   : > { %v2029_v34 = vld [vmem:[#allocation2 + $0x208] sm:$0xff]  ;;  %v5508_v13 = vpack.c.bf16 %v851_v5, %v850_v10  ;;  %v2326_v48 = vld [vmem:[#allocation2 + $0x171] sm:$0xff] }
 0x135   : > { %v922_v27 = vld [vmem:[#allocation2 + $0x1e8] sm:$0xff]  ;;  %v2328_v62 = vld [vmem:[#allocation2 + $0x191] sm:$0xff] }
 0x136   : > { %v2030_v25 = vld [vmem:[#allocation2 + $0x210] sm:$0xff]  ;;  %v858_v44 = vld [vmem:[#allocation2 + $0x127] sm:$0xff] }
 0x137   : > { %v923_v28 = vld [vmem:[#allocation2 + $0x1f0] sm:$0xff]  ;;  %v5443_v35 = vpack.c.bf16 %v2030_v25, %v2029_v34  ;;  %v854_v25 = vld [vmem:[#allocation2 + $0xe7] sm:$0xff] }
 0x138   : > { %v5441_v33 = vpack.c.bf16 %v923_v28, %v922_v27  ;;  %v853_v6 = vld [vmem:[#allocation2 + $0xcf] sm:$0xff] }
 0x139   : > { %v2315_v8 = vld [vmem:[#allocation2 + $0xc9] sm:$0xff]  ;;  %v5510_v14 = vpack.c.bf16 %v853_v6, %v852_v30  ;;  %v2322_v27 = vld [vmem:[#allocation2 + $0x131] sm:$0xff] }
 0x13a   : > { %4247 = vmatmul.mubr.msk.bf16.gmra.mrb[60].mxu0 %vm734_vm2, %v5441_v33  ;;  %4390 = vmatprep.mubr.msk.bf16.mxu1 %vm734_vm2, %v5441_v33  ;;  %v2317_v11 = vld [vmem:[#allocation2 + $0xe9] sm:$0xff]  ;;  %v5512_v15 = vpack.c.bf16 %v2316_v9, %v2315_v8  ;;  %v2330_v6 = vld [vmem:[#allocation2 + $0x1b1] sm:$0xff] }
 0x13b   : > { %4391 = vmatmul.mubr.msk.bf16.gmra.mrb[28].mxu1 %vm734_vm2, %v5443_v35  ;;  %4254 = vmatprep.mubr.msk.bf16.mxu0 %vm734_vm2, %v872_v31  ;;  %v5516_v17 = vpack.c.bf16 %v2318_v12, %v2317_v11  ;;  %v855_v18 = vld [vmem:[#allocation2 + $0xef] sm:$0xff]  ;;  %v864_v9 = vld [vmem:[#allocation2 + $0x187] sm:$0xff] }
 0x13c   : > { %4398 = vmatprep.mubr.msk.bf16.mxu1 %vm734_vm2, %v5449_v36  ;;  %v857_v20 = vld [vmem:[#allocation2 + $0x10f] sm:$0xff]  ;;  %v5524_v28 = vpack.c.bf16 %v855_v18, %v854_v25 }
 0x13d   : > { %v2319_v32 = vld [vmem:[#allocation2 + $0x109] sm:$0xff]  ;;  %v5526_v31 = vpack.c.bf16 %v857_v20, %v856_v29 }
 0x13e   : > { %v2321_v26 = vld [vmem:[#allocation2 + $0x129] sm:$0xff]  ;;  %v5528_v34 = vpack.c.bf16 %v2320_v24, %v2319_v32  ;;  %v2332_v32 = vld [vmem:[#allocation2 + $0x1d1] sm:$0xff] }
 0x13f   : > { %v5532_v38 = vpack.c.bf16 %v2322_v27, %v2321_v26  ;;  %v859_v39 = vld [vmem:[#allocation2 + $0x12f] sm:$0xff]  ;;  %v866_v24 = vld [vmem:[#allocation2 + $0x1a7] sm:$0xff] }
 0x140   : > { %v861_v40 = vld [vmem:[#allocation2 + $0x14f] sm:$0xff]  ;;  %v868_v29 = vld [vmem:[#allocation2 + $0x1c7] sm:$0xff] }
 0x141   : > { %v2323_v41 = vld [vmem:[#allocation2 + $0x149] sm:$0xff]  ;;  %v2334_v26 = vld [vmem:[#allocation2 + $0x1f1] sm:$0xff] }
 0x142   : > { %4255 = vmatmul.mubr.msk.bf16.vlgmr.msra.gmra.mrb[32].mxu0 %vm734_vm2, %v5456_v46  ;;  %v2325_v45 = vld [vmem:[#allocation2 + $0x169] sm:$0xff] }
 0x143   : > { %4258 = vmatprep.mubr.msk.bf16.mxu0 %vm734_vm2, %v5458_v49  ;;  %4399 = vmatmul.mubr.msk.bf16.vlgmr.msra.gmra.mrb[0].mxu1 %vm734_vm2, %v5460_v50  ;;  %v5548_v57 = vpack.c.bf16 %v2326_v48, %v2325_v45  ;;  %v863_v59 = vld [vmem:[#allocation2 + $0x16f] sm:$0xff] }
 0x144   : > { %4431 = vmatpush3.bf16.msra.mxu1 %v5305_v23  ;;  %4402 = vmatprep.mubr.msk.bf16.mxu1 %vm734_vm2, %v5467_v52  ;;  %v5488_v23 = vld [vmem:[%s6035_s4 + $0x30] sm:$0xff]  }
 0x145   : > { %4432 = vmatprep.subr.bf16.mxu1 %v4865_v51  ;;  %4287 = vmatpush3.bf16.msra.mxu0 %v5315_v37  ;;  %v5492_v37 = vpack.c.bf16 %v849_v55, %v848_v1  ;;  %v5544_v55 = vpack.c.bf16 %v2324_v43, %v2323_v41  ;;  %v865_v60 = vld [vmem:[#allocation2 + $0x18f] sm:$0xff]  ;;  %v862_v1 = vld [vmem:[#allocation2 + $0x167] sm:$0xff] }
 0x146   : > { %4288 = vmatprep.subr.bf16.mxu0 %v4867_v53  ;;  %v2327_v61 = vld [vmem:[#allocation2 + $0x189] sm:$0xff]  ;;  %v5556_v8 = vpack.c.bf16 %v863_v59, %v862_v1  ;;  %v5558_v10 = vpack.c.bf16 %v865_v60, %v864_v9  ;;  %v4869_v1 = vld [vmem:[%s6035_s4 + $0x78] sm:$0xff]  }
 0x147   : > { %v2329_v5 = vld [vmem:[#allocation2 + $0x1a9] sm:$0xff]  ;;  %v5560_v11 = vpack.c.bf16 %v2328_v62, %v2327_v61 }
 0x148   : > { %4433 = vmatpush3.bf16.msra.mxu1 %v4865_v51  ;;  %v5540_v51 = vpack.c.bf16 %v859_v39, %v858_v44  ;;  %v5564_v12 = vpack.c.bf16 %v2330_v6, %v2329_v5  ;;  %v867_v30 = vld [vmem:[#allocation2 + $0x1af] sm:$0xff]  ;;  %v870_v59 = vld [vmem:[#allocation2 + $0x1e7] sm:$0xff]  ;;  %v4871_v5 = vld [vmem:[%s6035_s4 + $0x38] sm:$0xff]  }
 0x149   : > { %4289 = vmatpush3.bf16.msra.mxu0 %v4867_v53  ;;  %4466 = vmatprep.subr.bf16.mxu1 %v5483_v56  ;;  %v860_v53 = vld [vmem:[#allocation2 + $0x147] sm:$0xff]  ;;  %v869_v18 = vld [vmem:[#allocation2 + $0x1cf] sm:$0xff]  ;;  %v5572_v27 = vpack.c.bf16 %v867_v30, %v866_v24 }
 0x14a   : > { %4259 = vmatmul.mubr.msk.bf16.gmra.mrb[36].mxu0 %vm734_vm2, %v5490_v0  ;;  %4322 = vmatprep.subr.bf16.mxu0 %v5488_v23  ;;  %v5542_v54 = vpack.c.bf16 %v861_v40, %v860_v53  ;;  %v2331_v20 = vld [vmem:[#allocation2 + $0x1c9] sm:$0xff]  ;;  %v5574_v39 = vpack.c.bf16 %v869_v18, %v868_v29  ;;  %v1388_v44 = vld [vmem:[#allocation2 + $0x11] sm:$0xff] }
 0x14b   : > { %4262 = vmatprep.mubr.msk.bf16.mxu0 %vm734_vm2, %v5492_v37  ;;  %4403 = vmatmul.mubr.msk.bf16.gmra.mrb[4].mxu1 %vm734_vm2, %v5494_v3  ;;  %v2333_v25 = vld [vmem:[#allocation2 + $0x1e9] sm:$0xff]  ;;  %v5576_v40 = vpack.c.bf16 %v2332_v32, %v2331_v20  ;;  %v2336_v53 = vld [vmem:[#allocation2 + $0x211] sm:$0xff] }
 0x14c   : > { %4406 = vmatprep.mubr.msk.bf16.mxu1 %vm734_vm2, %v5499_v4  ;;  %v5580_v41 = vpack.c.bf16 %v2334_v26, %v2333_v25  ;;  %v1387_v43 = vld [vmem:[#allocation2 + $0x9] sm:$0xff] }
 0x14d   : > { %v871_v45 = vld [vmem:[#allocation2 + $0x1ef] sm:$0xff]  ;;  %v1419_v60 = vpack.c.bf16 %v1388_v44, %v1387_v43  ;;  %v2642_v9 = vld [vmem:[#allocation2 + $0x227] sm:$0xff] }
 0x14e   : > { %v2335_v48 = vld [vmem:[#allocation2 + $0x209] sm:$0xff]  ;;  %v5588_v61 = vpack.c.bf16 %v871_v45, %v870_v59 }
 0x14f   : > { %v5590_v62 = vpack.c.bf16 %v2336_v53, %v2335_v48  ;;  %v2643_v30 = vld [vmem:[#allocation2 + $0x22f] sm:$0xff] }
 0x150   : > { %v2659_v18 = vpack.c.bf16 %v2643_v30, %v2642_v9  ;;  %v2919_v20 = vld [vmem:[#allocation2 + $0x50] sm:$0xff]  ;;  %v2918_v32 = vld [vmem:[#allocation2 + $0x48] sm:$0xff] }
 0x151   : > { %v2950_v24 = vpack.c.bf16 %v2919_v20, %v2918_v32  ;;  %v2921_v25 = vld [vmem:[#allocation2 + $0x70] sm:$0xff]  ;;  %v2920_v29 = vld [vmem:[#allocation2 + $0x68] sm:$0xff] }
 0x152   : > { %4263 = vmatmul.mubr.msk.bf16.gmra.mrb[40].mxu0 %vm734_vm2, %v5508_v13  ;;  %v2923_v26 = vld [vmem:[#allocation2 + $0x90] sm:$0xff]  ;;  %v2951_v43 = vpack.c.bf16 %v2921_v25, %v2920_v29  ;;  %v2922_v44 = vld [vmem:[#allocation2 + $0x88] sm:$0xff] }
 0x153   : > { %4266 = vmatprep.mubr.msk.bf16.mxu0 %vm734_vm2, %v5510_v14  ;;  %4407 = vmatmul.mubr.msk.bf16.gmra.mrb[8].mxu1 %vm734_vm2, %v5512_v15  ;;  %v4873_v45 = vld [vmem:[%s6035_s4 + $0x88] sm:$0xff]   ;;  %v2952_v48 = vpack.c.bf16 %v2923_v26, %v2922_v44 }
 0x154   : > { %4410 = vmatprep.mubr.msk.bf16.mxu1 %vm734_vm2, %v5516_v17 }
 0x15a   : > { %4267 = vmatmul.mubr.msk.bf16.gmra.mrb[44].mxu0 %vm734_vm2, %v5524_v28 }
 0x15b   : > { %4270 = vmatprep.mubr.msk.bf16.mxu0 %vm734_vm2, %v5526_v31  ;;  %4411 = vmatmul.mubr.msk.bf16.gmra.mrb[12].mxu1 %vm734_vm2, %v5528_v34 }
 0x15c   : > { %4414 = vmatprep.mubr.msk.bf16.mxu1 %vm734_vm2, %v5532_v38 }
 0x162   : > { %4271 = vmatmul.mubr.msk.bf16.gmra.mrb[48].mxu0 %vm734_vm2, %v5540_v51 }
 0x163   : > { %4274 = vmatprep.mubr.msk.bf16.mxu0 %vm734_vm2, %v5542_v54  ;;  %4415 = vmatmul.mubr.msk.bf16.gmra.mrb[16].mxu1 %vm734_vm2, %v5544_v55 }
 0x164   : > { %4418 = vmatprep.mubr.msk.bf16.mxu1 %vm734_vm2, %v5548_v57 }
 0x16a   : > { %4275 = vmatmul.mubr.msk.bf16.gmra.mrb[52].mxu0 %vm734_vm2, %v5556_v8 }
 0x16b   : > { %4278 = vmatprep.mubr.msk.bf16.mxu0 %vm734_vm2, %v5558_v10  ;;  %4419 = vmatmul.mubr.msk.bf16.gmra.mrb[20].mxu1 %vm734_vm2, %v5560_v11 }
 0x16c   : > { %4422 = vmatprep.mubr.msk.bf16.mxu1 %vm734_vm2, %v5564_v12 }
 0x172   : > { %4279 = vmatmul.mubr.msk.bf16.gmra.mrb[56].mxu0 %vm734_vm2, %v5572_v27 }
 0x173   : > { %4282 = vmatprep.mubr.msk.bf16.mxu0 %vm734_vm2, %v5574_v39  ;;  %4423 = vmatmul.mubr.msk.bf16.gmra.mrb[24].mxu1 %vm734_vm2, %v5576_v40 }
 0x174   : > { %4426 = vmatprep.mubr.msk.bf16.mxu1 %vm734_vm2, %v5580_v41 }
 0x17a   : > { %4283 = vmatmul.mubr.msk.bf16.gmra.mrb[60].mxu0 %vm734_vm2, %v5588_v61 }
 0x17b   : > { %4427 = vmatmul.mubr.msk.bf16.gmra.mrb[28].mxu1 %vm734_vm2, %v5590_v62  ;;  %4290 = vmatprep.mubr.msk.bf16.mxu0 %vm734_vm2, %v1419_v60  ;;  %v5820_v60 = vld [vmem:[%s6037_s6] ss:$0 sm:$0xff] }
 0x17c   : > { %4434 = vmatprep.mubr.msk.bf16.mxu1 %vm734_vm2, %v5458_v49 }
 0x182   : > { %4291 = vmatmul.mubr.msk.bf16.vlgmr.msra.gmra.mrb[32].mxu0 %vm734_vm2, %v5449_v36  ;;  %v4872_v36 = vld [vmem:[%s6035_s4 + $0x80] sm:$0xff]  }
 0x183   : > { %4294 = vmatprep.mubr.msk.bf16.mxu0 %vm734_vm2, %v5460_v50  ;;  %4435 = vmatmul.mubr.msk.bf16.vlgmr.msra.gmra.mrb[0].mxu1 %vm734_vm2, %v5490_v0 }
 0x184   : > { %4467 = vmatpush3.bf16.msra.mxu1 %v5483_v56  ;;  %4438 = vmatprep.mubr.msk.bf16.mxu1 %vm734_vm2, %v5492_v37  ;;  %v2641_v56 = vld [vmem:[#allocation2 + $0x20f] sm:$0xff] }
 0x185   : > { %4468 = vmatprep.subr.bf16.mxu1 %v4869_v1  ;;  %4323 = vmatpush3.bf16.msra.mxu0 %v5488_v23  ;;  %v2640_v23 = vld [vmem:[#allocation2 + $0x207] sm:$0xff] }
 0x186   : > { %4324 = vmatprep.subr.bf16.mxu0 %v4871_v5  ;;  %v2658_v6 = vpack.c.bf16 %v2641_v56, %v2640_v23 }
 0x188   : > { %4469 = vmatpush3.bf16.msra.mxu1 %v4869_v1 }
 0x189   : > { %4325 = vmatpush3.bf16.msra.mxu0 %v4871_v5  ;;  %4502 = vmatprep.subr.bf16.mxu1 %v4872_v36 }
 0x18a   : > { %4295 = vmatmul.mubr.msk.bf16.gmra.mrb[36].mxu0 %vm734_vm2, %v5467_v52 }
 0x18b   : > { %4298 = vmatprep.mubr.msk.bf16.mxu0 %vm734_vm2, %v5494_v3  ;;  %4439 = vmatmul.mubr.msk.bf16.gmra.mrb[4].mxu1 %vm734_vm2, %v5508_v13 }
 0x18c   : > { %4442 = vmatprep.mubr.msk.bf16.mxu1 %vm734_vm2, %v5510_v14 }
 0x192   : > { %4299 = vmatmul.mubr.msk.bf16.gmra.mrb[40].mxu0 %vm734_vm2, %v5499_v4 }
 0x193   : > { %4302 = vmatprep.mubr.msk.bf16.mxu0 %vm734_vm2, %v5512_v15  ;;  %4443 = vmatmul.mubr.msk.bf16.gmra.mrb[8].mxu1 %vm734_vm2, %v5524_v28 }
 0x194   : > { %4446 = vmatprep.mubr.msk.bf16.mxu1 %vm734_vm2, %v5526_v31 }
 0x19a   : > { %4303 = vmatmul.mubr.msk.bf16.gmra.mrb[44].mxu0 %vm734_vm2, %v5516_v17 }
 0x19b   : > { %4306 = vmatprep.mubr.msk.bf16.mxu0 %vm734_vm2, %v5528_v34  ;;  %4447 = vmatmul.mubr.msk.bf16.gmra.mrb[12].mxu1 %vm734_vm2, %v5540_v51 }
 0x19c   : > { %4450 = vmatprep.mubr.msk.bf16.mxu1 %vm734_vm2, %v5542_v54 }
 0x1a2   : > { %4307 = vmatmul.mubr.msk.bf16.gmra.mrb[48].mxu0 %vm734_vm2, %v5532_v38 }
 0x1a3   : > { %4310 = vmatprep.mubr.msk.bf16.mxu0 %vm734_vm2, %v5544_v55  ;;  %4451 = vmatmul.mubr.msk.bf16.gmra.mrb[16].mxu1 %vm734_vm2, %v5556_v8 }
 0x1a4   : > { %4454 = vmatprep.mubr.msk.bf16.mxu1 %vm734_vm2, %v5558_v10 }
 0x1aa   : > { %4311 = vmatmul.mubr.msk.bf16.gmra.mrb[52].mxu0 %vm734_vm2, %v5548_v57 }
 0x1ab   : > { %4314 = vmatprep.mubr.msk.bf16.mxu0 %vm734_vm2, %v5560_v11  ;;  %4455 = vmatmul.mubr.msk.bf16.gmra.mrb[20].mxu1 %vm734_vm2, %v5572_v27 }
 0x1ac   : > { %4458 = vmatprep.mubr.msk.bf16.mxu1 %vm734_vm2, %v5574_v39 }
 0x1b2   : > { %4315 = vmatmul.mubr.msk.bf16.gmra.mrb[56].mxu0 %vm734_vm2, %v5564_v12 }
 0x1b3   : > { %4318 = vmatprep.mubr.msk.bf16.mxu0 %vm734_vm2, %v5576_v40  ;;  %4459 = vmatmul.mubr.msk.bf16.gmra.mrb[24].mxu1 %vm734_vm2, %v5588_v61 }
 0x1b4   : > { %4462 = vmatprep.mubr.msk.bf16.mxu1 %vm734_vm2, %v2658_v6 }
 0x1ba   : > { %4319 = vmatmul.mubr.msk.bf16.gmra.mrb[60].mxu0 %vm734_vm2, %v5580_v41 }
 0x1bb   : > { %4326 = vmatprep.mubr.msk.bf16.mxu0 %vm734_vm2, %v5456_v46  ;;  %4463 = vmatmul.mubr.msk.bf16.gmra.mrb[28].mxu1 %vm734_vm2, %v2659_v18 }
 0x1bc   : > { %4470 = vmatprep.mubr.msk.bf16.mxu1 %vm734_vm2, %v2950_v24 }
 0x1c2   : > { %4327 = vmatmul.mubr.msk.bf16.vlgmr.msra.gmra.mrb[32].mxu0 %vm734_vm2, %v5458_v49 }
 0x1c3   : > { %4330 = vmatprep.mubr.msk.bf16.mxu0 %vm734_vm2, %v5490_v0  ;;  %4471 = vmatmul.mubr.msk.bf16.vlgmr.msra.gmra.mrb[0].mxu1 %vm734_vm2, %v2951_v43 }
 0x1c4   : > { %4503 = vmatpush3.bf16.msra.mxu1 %v4872_v36  ;;  %4474 = vmatprep.mubr.msk.bf16.mxu1 %vm734_vm2, %v2952_v48 }
 0x1c5   : > { %4504 = vmatprep.subr.bf16.mxu1 %v4873_v45 }
 0x1c8   : > { %4505 = vmatpush3.bf16.msra.mxu1 %v4873_v45 }
 0x1ca   : > { %4331 = vmatmul.mubr.msk.bf16.gmra.mrb[36].mxu0 %vm734_vm2, %v5492_v37 }
 0x1cb   : > { %4334 = vmatprep.mubr.msk.bf16.mxu0 %vm734_vm2, %v5508_v13  ;;  %4475 = vmatmul.mubr.msk.bf16.gmra.mrb[4].mxu1 %vm734_vm2, %v5335_v58  ;;  %v2948_v58 = vld [vmem:[#allocation2 + $0x228] sm:$0xff] }
 0x1cc   : > { %4478 = vmatprep.mubr.msk.bf16.mxu1 %vm734_vm2, %v5339_v63  ;;  %v2949_v63 = vld [vmem:[#allocation2 + $0x230] sm:$0xff] }
 0x1d2   : > { %4335 = vmatmul.mubr.msk.bf16.gmra.mrb[40].mxu0 %vm734_vm2, %v5510_v14 }
 0x1d3   : > { %4338 = vmatprep.mubr.msk.bf16.mxu0 %vm734_vm2, %v5524_v28  ;;  %4479 = vmatmul.mubr.msk.bf16.gmra.mrb[8].mxu1 %vm734_vm2, %v5359_v16  ;;  %v2965_v16 = vpack.c.bf16 %v2949_v63, %v2948_v58 }
 0x1d4   : > { %4482 = vmatprep.mubr.msk.bf16.mxu1 %vm734_vm2, %v5363_v21  ;;  %v3254_v21 = vld [vmem:[#allocation2 + $0x229] sm:$0xff] }
 0x1da   : > { %4339 = vmatmul.mubr.msk.bf16.gmra.mrb[44].mxu0 %vm734_vm2, %v5526_v31 }
 0x1db   : > { %4342 = vmatprep.mubr.msk.bf16.mxu0 %vm734_vm2, %v5540_v51  ;;  %4483 = vmatmul.mubr.msk.bf16.gmra.mrb[12].mxu1 %vm734_vm2, %v5383_v42  ;;  %v3255_v42 = vld [vmem:[#allocation2 + $0x231] sm:$0xff] }
 0x1dc   : > { %4486 = vmatprep.mubr.msk.bf16.mxu1 %vm734_vm2, %v5387_v47  ;;  %v3271_v47 = vpack.c.bf16 %v3255_v42, %v3254_v21 }
 0x1e2   : > { %4343 = vmatmul.mubr.msk.bf16.gmra.mrb[48].mxu0 %vm734_vm2, %v5542_v54 }
 0x1e3   : > { %4346 = vmatprep.mubr.msk.bf16.mxu0 %vm734_vm2, %v5556_v8  ;;  %4487 = vmatmul.mubr.msk.bf16.gmra.mrb[16].mxu1 %vm734_vm2, %v5407_v2 }
 0x1e4   : > { %4490 = vmatprep.mubr.msk.bf16.mxu1 %vm734_vm2, %v5411_v7 }
 0x1ea   : > { %4347 = vmatmul.mubr.msk.bf16.gmra.mrb[52].mxu0 %vm734_vm2, %v5558_v10 }
 0x1eb   : > { %4350 = vmatprep.mubr.msk.bf16.mxu0 %vm734_vm2, %v5572_v27  ;;  %4491 = vmatmul.mubr.msk.bf16.gmra.mrb[20].mxu1 %vm734_vm2, %v5429_v19 }
 0x1ec   : > { %4494 = vmatprep.mubr.msk.bf16.mxu1 %vm734_vm2, %v5431_v22 }
 0x1f2   : > { %4351 = vmatmul.mubr.msk.bf16.gmra.mrb[56].mxu0 %vm734_vm2, %v5574_v39 }
 0x1f3   : > { %4354 = vmatprep.mubr.msk.bf16.mxu0 %vm734_vm2, %v5588_v61  ;;  %4495 = vmatmul.mubr.msk.bf16.gmra.mrb[24].mxu1 %vm734_vm2, %v5441_v33 }
 0x1f4   : > { %4498 = vmatprep.mubr.msk.bf16.mxu1 %vm734_vm2, %v5443_v35 }
 0x1fa   : > { %4355 = vmatmul.mubr.msk.bf16.gmra.mrb[60].mxu0 %vm734_vm2, %v2658_v6 }
 0x1fb   : > { %4499 = vmatmul.mubr.msk.bf16.gmra.mrb[28].mxu1 %vm734_vm2, %v2965_v16 }
 0x1fc   : > { %4506 = vmatprep.mubr.msk.bf16.mxu1 %vm734_vm2, %v5460_v50 }
 0x203   : > { %4507 = vmatmul.mubr.msk.bf16.vlgmr.msra.gmra.mrb[0].mxu1 %vm734_vm2, %v5467_v52 }
 0x204   : > { %4510 = vmatprep.mubr.msk.bf16.mxu1 %vm734_vm2, %v5494_v3 }
 0x20b   : > { %4511 = vmatmul.mubr.msk.bf16.gmra.mrb[4].mxu1 %vm734_vm2, %v5499_v4 }
 0x20c   : > { %4514 = vmatprep.mubr.msk.bf16.mxu1 %vm734_vm2, %v5512_v15 }
 0x213   : > { %4515 = vmatmul.mubr.msk.bf16.gmra.mrb[8].mxu1 %vm734_vm2, %v5516_v17 }
 0x214   : > { %4518 = vmatprep.mubr.msk.bf16.mxu1 %vm734_vm2, %v5528_v34 }
 0x21b   : > { %4519 = vmatmul.mubr.msk.bf16.gmra.mrb[12].mxu1 %vm734_vm2, %v5532_v38 }
 0x21c   : > { %4522 = vmatprep.mubr.msk.bf16.mxu1 %vm734_vm2, %v5544_v55 }
 0x223   : > { %4523 = vmatmul.mubr.msk.bf16.gmra.mrb[16].mxu1 %vm734_vm2, %v5548_v57 }
 0x224   : > { %4526 = vmatprep.mubr.msk.bf16.mxu1 %vm734_vm2, %v5560_v11 }
 0x22b   : > { %4527 = vmatmul.mubr.msk.bf16.gmra.mrb[20].mxu1 %vm734_vm2, %v5564_v12 }
 0x22c   : > { %4530 = vmatprep.mubr.msk.bf16.mxu1 %vm734_vm2, %v5576_v40 }
 0x233   : > { %4531 = vmatmul.mubr.msk.bf16.gmra.mrb[24].mxu1 %vm734_vm2, %v5580_v41  ;;  %v5815_v41 = vld [vmem:[%s6036_s5] ss:$0 sm:$0xff] }
 0x234   : > { %4534 = vmatprep.mubr.msk.bf16.mxu1 %vm734_vm2, %v5590_v62 }
 0x23b   : > { %4535 = vmatmul.mubr.msk.bf16.gmra.mrb[28].mxu1 %vm734_vm2, %v3271_v47 }
 0x295   : > { %v4328_v2 = vpop.f32.mrb[32].mxu0 }
 0x296   : > { %v1840_v7 = vpop.f32.mrb[33].mxu0 }
 0x297   : > { %v4329_v19 = vpop.f32.mrb[34].mxu0 }
 0x298   : > { %v1843_v22 = vpop.f32.mrb[35].mxu0 }
 0x29d   : > { %v4332_v33 = vpop.f32.mrb[36].mxu0 }
 0x29e   : > { %v1856_v35 = vpop.f32.mrb[37].mxu0 }
 0x29f   : > { %v4333_v46 = vpop.f32.mrb[38].mxu0 }
 0x2a0   : > { %v5761_v49 = vpop.f32.mrb[39].mxu0 }
 0x2a5   : > { %v5763_v50 = vpop.f32.mrb[40].mxu0 }
 0x2a6   : > { %v5765_v52 = vpop.f32.mrb[41].mxu0 }
 0x2a7   : > { %v5767_v0 = vpop.f32.mrb[42].mxu0 }
 0x2a8   : > { %v5769_v37 = vpop.f32.mrb[43].mxu0 }
 0x2ad   : > { %v5771_v3 = vpop.f32.mrb[44].mxu0 }
 0x2ae   : > { %v5773_v4 = vpop.f32.mrb[45].mxu0 }
 0x2af   : > { %v5775_v13 = vpop.f32.mrb[46].mxu0 }
 0x2b0   : > { %v5777_v14 = vpop.f32.mrb[47].mxu0 }
 0x2b5   : > { %v5779_v15 = vpop.f32.mrb[48].mxu0 }
 0x2b6   : > { %v5781_v17 = vpop.f32.mrb[49].mxu0 }
 0x2b7   : > { %v5783_v28 = vpop.f32.mrb[50].mxu0 }
 0x2b8   : > { %v5785_v31 = vpop.f32.mrb[51].mxu0 }
 0x2bd   : > { %v5787_v34 = vpop.f32.mrb[52].mxu0 }
 0x2be   : > { %v5789_v38 = vpop.f32.mrb[53].mxu0 }
 0x2bf   : > { %v5791_v51 = vpop.f32.mrb[54].mxu0 }
 0x2c0   : > { %v5793_v54 = vpop.f32.mrb[55].mxu0 }
 0x2c5   : > { %v5795_v55 = vpop.f32.mrb[56].mxu0 }
 0x2c6   : > { %v5797_v57 = vpop.f32.mrb[57].mxu0 }
 0x2c7   : > { %v5799_v8 = vpop.f32.mrb[58].mxu0 }
 0x2c8   : > { %v5801_v10 = vpop.f32.mrb[59].mxu0 }
 0x2cd   : > { %v5803_v11 = vpop.f32.mrb[60].mxu0 }
 0x2ce   : > { %v5805_v12 = vpop.f32.mrb[61].mxu0 }
 0x2cf   : > { %v5807_v27 = vpop.f32.mrb[62].mxu0 }
 0x2d0   : > { %v5809_v39 = vpop.f32.mrb[63].mxu0 }
 0x2d6   : > { %v4508_v40 = vpop.f32.mrb[0].mxu1 }
 0x2d7   : > { %v4538_v53 = vadd.f32 %v4508_v40, %v4328_v2  ;;  %v3371_v59 = vpop.f32.mrb[1].mxu1 }
 0x2d8   : > { %v4539_v61 = vadd.f32 %v3371_v59, %v1840_v7  ;;  %v4509_v62 = vpop.f32.mrb[2].mxu1 }
 0x2d9   : > { %v3539_v1 = vmul.f32 %v4538_v53, %v5815_v41  ;;  %v4540_v5 = vadd.f32 %v4509_v62, %v4329_v19  ;;  %v3374_v36 = vpop.f32.mrb[3].mxu1 }
 0x2da   : > { %v3537_v56 = vmul.f32 %v4539_v61, %v5815_v41  ;;  %v4541_v23 = vadd.f32 %v3374_v36, %v1843_v22 }
 0x2db   : > { %v3578_v6 = vadd.f32 %v5820_v60, %v3539_v1  ;;  %v3540_v9 = vmul.f32 %v4540_v5, %v5815_v41 }
 0x2dc   : > { %v3576_v30 = vadd.f32 %v5820_v60, %v3537_v56  ;;  %v3538_v18 = vmul.f32 %v4541_v23, %v5815_v41 }
 0x2dd   : > { %v3610_v20 = vmax.f32 %v3578_v6, 0.0  ;;  %v3579_v32 = vadd.f32 %v5820_v60, %v3540_v9 }
 0x2de   : > { %v3608_v24 = vmax.f32 %v3576_v30, 0.0  ;;  %v3577_v25 = vadd.f32 %v5820_v60, %v3538_v18  ;;  %v4512_v26 = vpop.f32.mrb[4].mxu1 }
 0x2df   : > { %3642 = vst.msk [vmem:[%s5832_s14 + $0x10] sm:$0xff] %vm734_vm2, %v3610_v20  ;;  %v3611_v29 = vmax.f32 %v3579_v32, 0.0  ;;  %v4542_v43 = vadd.f32 %v4512_v26, %v4332_v33  ;;  %v3387_v44 = vpop.f32.mrb[5].mxu1 }
 0x2e0   : > { %3640 = vst.msk [vmem:[%s5832_s14] sm:$0xff] %vm734_vm2, %v3608_v24  ;;  %v3609_v45 = vmax.f32 %v3577_v25, 0.0  ;;  %v4543_v48 = vadd.f32 %v3387_v44, %v1856_v35  ;;  %v4513_v58 = vpop.f32.mrb[6].mxu1 }
 0x2e1   : > { %3643 = vst.msk [vmem:[%s5832_s14 + $0x18] sm:$0xff] %vm734_vm2, %v3611_v29  ;;  %v3543_v63 = vmul.f32 %v4542_v43, %v5815_v41  ;;  %v4544_v16 = vadd.f32 %v4513_v58, %v4333_v46  ;;  %v3390_v21 = vpop.f32.mrb[7].mxu1 }
 0x2e2   : > { %3641 = vst.msk [vmem:[%s5832_s14 + $0x8] sm:$0xff] %vm734_vm2, %v3609_v45  ;;  %v3541_v42 = vmul.f32 %v4543_v48, %v5815_v41  ;;  %v4545_v47 = vadd.f32 %v3390_v21, %v5761_v49 }
 0x2e3   : > { %v3582_v2 = vadd.f32 %v5820_v60, %v3543_v63  ;;  %v3544_v7 = vmul.f32 %v4544_v16, %v5815_v41 }
 0x2e4   : > { %v3580_v19 = vadd.f32 %v5820_v60, %v3541_v42  ;;  %v3542_v22 = vmul.f32 %v4545_v47, %v5815_v41 }
 0x2e5   : > { %v3614_v33 = vmax.f32 %v3582_v2, 0.0  ;;  %v3583_v35 = vadd.f32 %v5820_v60, %v3544_v7 }
 0x2e6   : > { %v3612_v46 = vmax.f32 %v3580_v19, 0.0  ;;  %v3581_v40 = vadd.f32 %v5820_v60, %v3542_v22  ;;  %v4516_v53 = vpop.f32.mrb[8].mxu1 }
 0x2e7   : > { %3646 = vst.msk [vmem:[%s5832_s14 + $0x30] sm:$0xff] %vm734_vm2, %v3614_v33  ;;  %v3615_v49 = vmax.f32 %v3583_v35, 0.0  ;;  %v4546_v59 = vadd.f32 %v4516_v53, %v5763_v50  ;;  %v3403_v61 = vpop.f32.mrb[9].mxu1 }
 0x2e8   : > { %3644 = vst.msk [vmem:[%s5832_s14 + $0x20] sm:$0xff] %vm734_vm2, %v3612_v46  ;;  %v3613_v62 = vmax.f32 %v3581_v40, 0.0  ;;  %v4547_v1 = vadd.f32 %v3403_v61, %v5765_v52  ;;  %v4517_v5 = vpop.f32.mrb[10].mxu1 }
 0x2e9   : > { %3647 = vst.msk [vmem:[%s5832_s14 + $0x38] sm:$0xff] %vm734_vm2, %v3615_v49  ;;  %v3547_v36 = vmul.f32 %v4546_v59, %v5815_v41  ;;  %v4548_v56 = vadd.f32 %v4517_v5, %v5767_v0  ;;  %v3406_v23 = vpop.f32.mrb[11].mxu1 }
 0x2ea   : > { %3645 = vst.msk [vmem:[%s5832_s14 + $0x28] sm:$0xff] %vm734_vm2, %v3613_v62  ;;  %v3545_v50 = vmul.f32 %v4547_v1, %v5815_v41  ;;  %v4549_v6 = vadd.f32 %v3406_v23, %v5769_v37 }
 0x2eb   : > { %v3586_v9 = vadd.f32 %v5820_v60, %v3547_v36  ;;  %v3548_v52 = vmul.f32 %v4548_v56, %v5815_v41 }
 0x2ec   : > { %v3584_v30 = vadd.f32 %v5820_v60, %v3545_v50  ;;  %v3546_v18 = vmul.f32 %v4549_v6, %v5815_v41 }
 0x2ed   : > { %v3618_v20 = vmax.f32 %v3586_v9, 0.0  ;;  %v3587_v0 = vadd.f32 %v5820_v60, %v3548_v52 }
 0x2ee   : > { %v3616_v32 = vmax.f32 %v3584_v30, 0.0  ;;  %v3585_v24 = vadd.f32 %v5820_v60, %v3546_v18  ;;  %v4520_v25 = vpop.f32.mrb[12].mxu1 }
 0x2ef   : > { %3650 = vst.msk [vmem:[%s5832_s14 + $0x50] sm:$0xff] %vm734_vm2, %v3618_v20  ;;  %v3619_v37 = vmax.f32 %v3587_v0, 0.0  ;;  %v4550_v26 = vadd.f32 %v4520_v25, %v5771_v3  ;;  %v3419_v29 = vpop.f32.mrb[13].mxu1 }
 0x2f0   : > { %3648 = vst.msk [vmem:[%s5832_s14 + $0x40] sm:$0xff] %vm734_vm2, %v3616_v32  ;;  %v3617_v43 = vmax.f32 %v3585_v24, 0.0  ;;  %v4551_v44 = vadd.f32 %v3419_v29, %v5773_v4  ;;  %v4521_v45 = vpop.f32.mrb[14].mxu1 }
 0x2f1   : > { %3651 = vst.msk [vmem:[%s5832_s14 + $0x58] sm:$0xff] %vm734_vm2, %v3619_v37  ;;  %v3551_v48 = vmul.f32 %v4550_v26, %v5815_v41  ;;  %v4552_v58 = vadd.f32 %v4521_v45, %v5775_v13  ;;  %v3422_v63 = vpop.f32.mrb[15].mxu1 }
 0x2f2   : > { %3649 = vst.msk [vmem:[%s5832_s14 + $0x48] sm:$0xff] %vm734_vm2, %v3617_v43  ;;  %v3549_v3 = vmul.f32 %v4551_v44, %v5815_v41  ;;  %v4553_v16 = vadd.f32 %v3422_v63, %v5777_v14 }
 0x2f3   : > { %v3590_v21 = vadd.f32 %v5820_v60, %v3551_v48  ;;  %v3552_v4 = vmul.f32 %v4552_v58, %v5815_v41 }
 0x2f4   : > { %v3588_v42 = vadd.f32 %v5820_v60, %v3549_v3  ;;  %v3550_v47 = vmul.f32 %v4553_v16, %v5815_v41 }
 0x2f5   : > { %v3622_v2 = vmax.f32 %v3590_v21, 0.0  ;;  %v3591_v13 = vadd.f32 %v5820_v60, %v3552_v4 }
 0x2f6   : > { %v3620_v7 = vmax.f32 %v3588_v42, 0.0  ;;  %v3589_v19 = vadd.f32 %v5820_v60, %v3550_v47  ;;  %v4524_v22 = vpop.f32.mrb[16].mxu1 }
 0x2f7   : > { %3654 = vst.msk [vmem:[%s5832_s14 + $0x70] sm:$0xff] %vm734_vm2, %v3622_v2  ;;  %v3623_v14 = vmax.f32 %v3591_v13, 0.0  ;;  %v4554_v33 = vadd.f32 %v4524_v22, %v5779_v15  ;;  %v3435_v35 = vpop.f32.mrb[17].mxu1 }
 0x2f8   : > { %3652 = vst.msk [vmem:[%s5832_s14 + $0x60] sm:$0xff] %vm734_vm2, %v3620_v7  ;;  %v3621_v46 = vmax.f32 %v3589_v19, 0.0  ;;  %v4555_v40 = vadd.f32 %v3435_v35, %v5781_v17  ;;  %v4525_v53 = vpop.f32.mrb[18].mxu1 }
 0x2f9   : > { %3655 = vst.msk [vmem:[%s5832_s14 + $0x78] sm:$0xff] %vm734_vm2, %v3623_v14  ;;  %v3555_v49 = vmul.f32 %v4554_v33, %v5815_v41  ;;  %v4556_v59 = vadd.f32 %v4525_v53, %v5783_v28  ;;  %v3438_v61 = vpop.f32.mrb[19].mxu1 }
 0x2fa   : > { %3653 = vst.msk [vmem:[%s5832_s14 + $0x68] sm:$0xff] %vm734_vm2, %v3621_v46  ;;  %v3553_v15 = vmul.f32 %v4555_v40, %v5815_v41  ;;  %v4557_v62 = vadd.f32 %v3438_v61, %v5785_v31 }
 0x2fb   : > { %v3594_v1 = vadd.f32 %v5820_v60, %v3555_v49  ;;  %v3556_v17 = vmul.f32 %v4556_v59, %v5815_v41 }
 0x2fc   : > { %v3592_v5 = vadd.f32 %v5820_v60, %v3553_v15  ;;  %v3554_v36 = vmul.f32 %v4557_v62, %v5815_v41 }
 0x2fd   : > { %v3626_v56 = vmax.f32 %v3594_v1, 0.0  ;;  %v3595_v28 = vadd.f32 %v5820_v60, %v3556_v17 }
 0x2fe   : > { %v3624_v23 = vmax.f32 %v3592_v5, 0.0  ;;  %v3593_v50 = vadd.f32 %v5820_v60, %v3554_v36  ;;  %v4528_v6 = vpop.f32.mrb[20].mxu1 }
 0x2ff   : > { %3658 = vst.msk [vmem:[%s5832_s14 + $0x90] sm:$0xff] %vm734_vm2, %v3626_v56  ;;  %v3627_v31 = vmax.f32 %v3595_v28, 0.0  ;;  %v4558_v9 = vadd.f32 %v4528_v6, %v5787_v34  ;;  %v3451_v52 = vpop.f32.mrb[21].mxu1 }
 0x300   : > { %3656 = vst.msk [vmem:[%s5832_s14 + $0x80] sm:$0xff] %vm734_vm2, %v3624_v23  ;;  %v3625_v30 = vmax.f32 %v3593_v50, 0.0  ;;  %v4559_v18 = vadd.f32 %v3451_v52, %v5789_v38  ;;  %v4529_v20 = vpop.f32.mrb[22].mxu1 }
 0x301   : > { %3659 = vst.msk [vmem:[%s5832_s14 + $0x98] sm:$0xff] %vm734_vm2, %v3627_v31  ;;  %v3559_v0 = vmul.f32 %v4558_v9, %v5815_v41  ;;  %v4560_v32 = vadd.f32 %v4529_v20, %v5791_v51  ;;  %v3454_v24 = vpop.f32.mrb[23].mxu1 }
 0x302   : > { %3657 = vst.msk [vmem:[%s5832_s14 + $0x88] sm:$0xff] %vm734_vm2, %v3625_v30  ;;  %v3557_v34 = vmul.f32 %v4559_v18, %v5815_v41  ;;  %v4561_v25 = vadd.f32 %v3454_v24, %v5793_v54 }
 0x303   : > { %v3598_v37 = vadd.f32 %v5820_v60, %v3559_v0  ;;  %v3560_v38 = vmul.f32 %v4560_v32, %v5815_v41 }
 0x304   : > { %v3596_v26 = vadd.f32 %v5820_v60, %v3557_v34  ;;  %v3558_v29 = vmul.f32 %v4561_v25, %v5815_v41 }
 0x305   : > { %v3630_v43 = vmax.f32 %v3598_v37, 0.0  ;;  %v3599_v51 = vadd.f32 %v5820_v60, %v3560_v38 }
 0x306   : > { %v3628_v44 = vmax.f32 %v3596_v26, 0.0  ;;  %v3597_v45 = vadd.f32 %v5820_v60, %v3558_v29  ;;  %v4532_v48 = vpop.f32.mrb[24].mxu1 }
 0x307   : > { %3662 = vst.msk [vmem:[%s5832_s14 + $0xb0] sm:$0xff] %vm734_vm2, %v3630_v43  ;;  %v3631_v54 = vmax.f32 %v3599_v51, 0.0  ;;  %v4562_v58 = vadd.f32 %v4532_v48, %v5795_v55  ;;  %v3467_v63 = vpop.f32.mrb[25].mxu1 }
 0x308   : > { %3660 = vst.msk [vmem:[%s5832_s14 + $0xa0] sm:$0xff] %vm734_vm2, %v3628_v44  ;;  %v3629_v3 = vmax.f32 %v3597_v45, 0.0  ;;  %v4563_v16 = vadd.f32 %v3467_v63, %v5797_v57  ;;  %v4533_v21 = vpop.f32.mrb[26].mxu1 }
 0x309   : > { %3663 = vst.msk [vmem:[%s5832_s14 + $0xb8] sm:$0xff] %vm734_vm2, %v3631_v54  ;;  %v3563_v4 = vmul.f32 %v4562_v58, %v5815_v41  ;;  %v4564_v42 = vadd.f32 %v4533_v21, %v5799_v8  ;;  %v3470_v47 = vpop.f32.mrb[27].mxu1 }
 0x30a   : > { %3661 = vst.msk [vmem:[%s5832_s14 + $0xa8] sm:$0xff] %vm734_vm2, %v3629_v3  ;;  %v3561_v55 = vmul.f32 %v4563_v16, %v5815_v41  ;;  %v4565_v2 = vadd.f32 %v3470_v47, %v5801_v10 }
 0x30b   : > { %v3602_v13 = vadd.f32 %v5820_v60, %v3563_v4  ;;  %v3564_v57 = vmul.f32 %v4564_v42, %v5815_v41 }
 0x30c   : > { %v3600_v7 = vadd.f32 %v5820_v60, %v3561_v55  ;;  %v3562_v19 = vmul.f32 %v4565_v2, %v5815_v41 }
 0x30d   : > { %v3634_v22 = vmax.f32 %v3602_v13, 0.0  ;;  %v3603_v8 = vadd.f32 %v5820_v60, %v3564_v57 }
 0x30e   : > { %v3632_v14 = vmax.f32 %v3600_v7, 0.0  ;;  %v3601_v33 = vadd.f32 %v5820_v60, %v3562_v19  ;;  %v4536_v35 = vpop.f32.mrb[28].mxu1 }
 0x30f   : > { %3666 = vst.msk [vmem:[%s5832_s14 + $0xd0] sm:$0xff] %vm734_vm2, %v3634_v22  ;;  %v3635_v10 = vmax.f32 %v3603_v8, 0.0  ;;  %v4566_v46 = vadd.f32 %v4536_v35, %v5803_v11  ;;  %v3483_v40 = vpop.f32.mrb[29].mxu1 }
 0x310   : > { %3664 = vst.msk [vmem:[%s5832_s14 + $0xc0] sm:$0xff] %vm734_vm2, %v3632_v14  ;;  %v3633_v53 = vmax.f32 %v3601_v33, 0.0  ;;  %v4567_v49 = vadd.f32 %v3483_v40, %v5805_v12  ;;  %v4537_v59 = vpop.f32.mrb[30].mxu1 }
 0x311   : > { %3667 = vst.msk [vmem:[%s5832_s14 + $0xd8] sm:$0xff] %vm734_vm2, %v3635_v10  ;;  %v3567_v61 = vmul.f32 %v4566_v46, %v5815_v41  ;;  %v4568_v15 = vadd.f32 %v4537_v59, %v5807_v27  ;;  %v3486_v62 = vpop.f32.mrb[31].mxu1 }
 0x312   : > { %3665 = vst.msk [vmem:[%s5832_s14 + $0xc8] sm:$0xff] %vm734_vm2, %v3633_v53  ;;  %v3565_v11 = vmul.f32 %v4567_v49, %v5815_v41  ;;  %v4569_v1 = vadd.f32 %v3486_v62, %v5809_v39 }
 0x313   : > { %v3606_v17 = vadd.f32 %v5820_v60, %v3567_v61  ;;  %v3568_v12 = vmul.f32 %v4568_v15, %v5815_v41 }
 0x314   : > { %v3604_v5 = vadd.f32 %v5820_v60, %v3565_v11  ;;  %v3566_v36 = vmul.f32 %v4569_v1, %v5815_v41 }
 0x315   : > { %v3638_v27 = vmax.f32 %v3606_v17, 0.0  ;;  %v3607_v56 = vadd.f32 %v5820_v60, %v3568_v12 }
 0x316   : > { %v3636_v28 = vmax.f32 %v3604_v5, 0.0  ;;  %v3605_v39 = vadd.f32 %v5820_v60, %v3566_v36 }
 0x317   : > { %3670 = vst.msk [vmem:[%s5832_s14 + $0xf0] sm:$0xff] %vm734_vm2, %v3638_v27  ;;  %v3639_v23 = vmax.f32 %v3607_v56, 0.0 }
 0x318   : > { %3668 = vst.msk [vmem:[%s5832_s14 + $0xe0] sm:$0xff] %vm734_vm2, %v3636_v28  ;;  %v3637_v41 = vmax.f32 %v3605_v39, 0.0 }
 0x319   : > { %3671 = vst.msk [vmem:[%s5832_s14 + $0xf8] sm:$0xff] %vm734_vm2, %v3639_v23 }
 0x31a   : > { %3669 = vst.msk [vmem:[%s5832_s14 + $0xe8] sm:$0xff] %vm734_vm2, %v3637_v41 }
 0x31b   : > { %4887 = shalt.err (!%p4884_p3)
}
 0x31c   : > { %s4888_s22 = scalar_lea.hbm %s5978_s19, 4096  ;;  %s4892_s13 = scalar_lea.hbm %s6038_s7, 8192 }
 0x31d   : > { %p4889_p4 = scmp.ne.s32.totalorder %s5978_s19, %s4888_s22  ;;  %p4893_p9 = scmp.lt.u32.totalorder %s5978_s19, %s6038_s7 }
 0x31e   : > { %p4894_p10 = scmp.lt.u32.totalorder %s4892_s13, %s4888_s22  ;;  %p4896_p12 = scmp.lt.u32.totalorder %s4888_s22, %s5978_s19 }
 0x31f   : > { %p4890_p7 = pnand %p4889_p4, %p5020_p5 }
 0x320   : > { %p4895_p11 = por %p4894_p10, %p4893_p9 }
 0x321   : > { %p4891_p8 = pneg %p4890_p7 }
 0x322   : > { %p4897_p13 = por %p4896_p12, %p4895_p11 }
 0x324   : > { %p4898_p0 = pnand %p4897_p13, %p4891_p8 }
 0x326   : > { %4901 = shalt.err (!%p4898_p0)
}
 0x327   : > { %s4940_s17 = smov 128   ;;  %s4941_s18 = smov 8  }
 0x328   : > { %4795 = dma.vmem_to_hbm [thread:$0]  (%p5020_p5), %s5980_s16, 4096, %s5978_s19, %s5990_s28, %s4940_s17, %s4940_s17, %s4941_s18  }
 0x329 PF: > { %p4801_p1 = scmp.ge.s32.totalorder %s4936_s27, 2  ;;  %s3701_s20 = sand.u32 1, %s4924_s24  }
 0x32a   : > { %s3702_s21 = scalar_lea.sflag [#allocation4], %s3701_s20 }
 0x32b   : > { %p4798_p2 = pnand %p4801_p1, %p5024_p6 }
 0x32d   : > { %4919 = dma.done.wait (!%p4798_p2), %s3702_s21, 4096  }
 0x32e   : > { %4921 = vsyncadd (!%p4798_p2), %s3702_s21, 4294963200  ;;  %p17_p3 = scmp.ge.s32.totalorder %s5007_s30, 4   ;;  %s6041_s24 = smov %s4928_s25 }
 0x32f   : > { %s6042_s25 = smov %s4932_s26  ;;  %s6043_s26 = smov %s5018_s10 }
 0x330   : > { %s6044_s27 = smov %s5007_s30  ;;  %19 = sbr.rel (!%p17_p3) target bundleno = 3 (0x3), region = 93 }
 0x337   :  { %3707 = vsyncpa [#allocation4], 1 }
 0x338   :  { %3709 = vsyncpa [#allocation4 + $0x1], 1 }

</bundles_post_ra>
